<compile_context>
chip_gen: v6e
topology: v6e:2x2x1
jax: 0.10.0
libtpu: 0.0.40
codegen_flags: <defaults>
</compile_context>

<pallas_src>
import functools

import jax
import jax.numpy as jnp
from jax.experimental import pallas as pl
from jax.experimental.pallas import tpu as pltpu  # noqa: F401  (TPU backend)


# ----------------------------------------------------------------------------
# Packed-operand layout (shared by pack_params and the kernel).
# ----------------------------------------------------------------------------
def _wcat_row_offsets(pix, seq_emb, hidden, latent):
    """Row offsets of each 128-column weight inside packed W_cat."""
    o_emb = 0
    o_ih = o_emb + pix
    o_hh = o_ih + seq_emb
    o_head = o_hh + hidden
    o_g1 = o_head + hidden
    o_e1 = o_g1 + latent
    total = o_e1 + pix
    return o_emb, o_ih, o_hh, o_head, o_g1, o_e1, total


def _bcat_offsets(pix, seq_emb, hidden, latent, g_hidden, e_hidden):
    """Lane offsets of each bias inside the packed (1, total) bias row."""
    ob_emb = 0
    ob_lstm = ob_emb + seq_emb
    ob_head = ob_lstm + 4 * hidden
    ob_g1 = ob_head + 2 * latent
    ob_g2 = ob_g1 + g_hidden
    ob_e1 = ob_g2 + pix
    ob_e2 = ob_e1 + e_hidden
    total = ob_e2 + latent
    return ob_emb, ob_lstm, ob_head, ob_g1, ob_g2, ob_e1, ob_e2, total


# ----------------------------------------------------------------------------
# Single fused forward kernel: everything VMEM-resident, no grid.
# ----------------------------------------------------------------------------
def _forward_kernel(
    x2d_ref, y_ref, eps_ref, wcat_ref, wout_ref, bcat_ref,
    y_recon_ref, small_ref,
    *, T, Bp, pix, seq_emb, hidden, latent, g_hidden, e_hidden,
):
    """Whole LSTMSSuperBiGAN forward.

    x2d_ref : (T*Bp, pix)       time-major frame sequence, frames stacked on rows
    y_ref   : (Bp, pix)         image for gan.encode
    eps_ref : (Bp, latent)      N(0,1) noise for the reparameterization trick
    wcat_ref: (sum_rows, 128)   row-stacked 128-column weights
    wout_ref: (128, pix+latent) column-stacked wide-output weights [W_g2 | W_e2]
    bcat_ref: (1, sum_lanes)    all biases packed lane-dense
    """
    f32 = jnp.float32
    H = hidden
    o_emb, o_ih, o_hh, o_head, o_g1, o_e1, _ = _wcat_row_offsets(
        pix, seq_emb, H, latent)
    ob_emb, ob_lstm, ob_head, ob_g1, ob_g2, ob_e1, ob_e2, _ = _bcat_offsets(
        pix, seq_emb, H, latent, g_hidden, e_hidden)

    # ---- seq_encoder, non-recurrent part: hoisted out of the T loop and
    # ---- batched over all frames; biases added exactly once (no per-step
    # ---- broadcast_in_dim on the serial path).
    # TODO(synk): the PyTorch LSTMSequentialEncoder uses a CNN frame embedder;
    #             modeled as a dense layer with the same I/O shape + ReLU.
    emb_all = jnp.maximum(
        jnp.dot(x2d_ref[...], wcat_ref[o_emb:o_emb + pix, :],
                preferred_element_type=f32)
        + bcat_ref[:, ob_emb:ob_emb + seq_emb], 0.0)            # (T*Bp, seq_emb)
    pre_gates = (
        jnp.dot(emb_all, wcat_ref[o_ih:o_ih + seq_emb, :],
                preferred_element_type=f32)
        + bcat_ref[:, ob_lstm:ob_lstm + 4 * H])                 # (T*Bp, 4H)

    # ---- LSTM recurrence: only h @ W_hh + elementwise gate math remain.
    # W_hh is (H, 4H) f32 = 4 vregs — cheap to keep live across the unroll.
    # (Options once shapes grow: bf16 MXU operands on v6e/v7x, pad H to 128
    #  lanes, or lax.fori_loop(..., unroll=True) for large T.)
    w_hh = wcat_ref[o_hh:o_hh + H, :]
    h = jnp.zeros((Bp, H), f32)
    c = jnp.zeros((Bp, H), f32)
    for t in range(T):
        gates = (pre_gates[t * Bp:(t + 1) * Bp, :]
                 + jnp.dot(h, w_hh, preferred_element_type=f32))  # (Bp, 4H)
        sig = jax.nn.sigmoid(gates)          # one full-vreg EUP pass
        tnh = jnp.tanh(gates)                # one full-vreg EUP pass
        # PyTorch nn.LSTM gate order: i, f, g, o
        i_g = sig[:, 0 * H:1 * H]
        f_g = sig[:, 1 * H:2 * H]
        g_g = tnh[:, 2 * H:3 * H]
        o_g = sig[:, 3 * H:4 * H]
        c = f_g * c + i_g * g_g
        h = o_g * jnp.tanh(c)

    # ---- fused mu|logvar head (one lane-dense matmul) + reparameterized z.
    head = (jnp.dot(h, wcat_ref[o_head:o_head + H, :],
                    preferred_element_type=f32)
            + bcat_ref[:, ob_head:ob_head + 2 * latent])
    mu = head[:, :latent]
    logvar = head[:, latent:]
    std = jnp.exp(0.5 * logvar)
    z = mu + std * eps_ref[...]

    # ---- gan.generate(z): intermediate g1 never leaves VMEM.
    g1 = jnp.maximum(
        jnp.dot(z, wcat_ref[o_g1:o_g1 + latent, :],
                preferred_element_type=f32)
        + bcat_ref[:, ob_g1:ob_g1 + g_hidden], 0.0)
    y_recon = jnp.tanh(
        jnp.dot(g1, wout_ref[:, 0:pix], preferred_element_type=f32)
        + bcat_ref[:, ob_g2:ob_g2 + pix])

    # ---- gan.encode(y): intermediate e1 never leaves VMEM.
    e1 = jnp.maximum(
        jnp.dot(y_ref[...], wcat_ref[o_e1:o_e1 + pix, :],
                preferred_element_type=f32)
        + bcat_ref[:, ob_e1:ob_e1 + e_hidden], 0.0)
    z_rec = (jnp.dot(e1, wout_ref[:, pix:pix + latent],
                     preferred_element_type=f32)
             + bcat_ref[:, ob_e2:ob_e2 + latent])

    # ---- lane-dense stores: (Bp, pix) image + one packed (Bp, 4*latent)
    # ---- block holding [z | mu | std | z_recon] (unmasked vst, single DMA).
    y_recon_ref[...] = y_recon
    small_ref[...] = jnp.concatenate([z, mu, std, z_rec], axis=1)


# ----------------------------------------------------------------------------
# Parameter initialization (deterministic; biases stored as (1, N) rows,
# mu/logvar heads pre-fused along N — static, done once at init).
# ----------------------------------------------------------------------------
def init_params(key, *, image_dim, image_channel, seq_emb, lstm_hidden,
                latent_dim, g_hidden, e_hidden):
    pix = image_channel * image_dim * image_dim
    ks = jax.random.split(key, 16)

    def w(k, shape, fan_in):
        return jax.random.normal(k, shape, jnp.float32) / jnp.sqrt(
            jnp.float32(fan_in))

    def b(k, n):
        return 0.1 * jax.random.normal(k, (1, n), jnp.float32)

    w_mu = w(ks[3], (lstm_hidden, latent_dim), lstm_hidden)
    w_lv = w(ks[4], (lstm_hidden, latent_dim), lstm_hidden)

    return {
        # seq_encoder: frame embedder
        "W_emb": w(ks[0], (pix, seq_emb), pix),
        "b_emb": b(ks[9], seq_emb),
        # seq_encoder: LSTM cell (gates i,f,g,o concatenated along N)
        "W_ih": w(ks[1], (seq_emb, 4 * lstm_hidden), seq_emb),
        "W_hh": w(ks[2], (lstm_hidden, 4 * lstm_hidden), lstm_hidden),
        # PyTorch nn.LSTM has bias_ih + bias_hh; represented pre-summed here.
        "b_lstm": b(ks[10], 4 * lstm_hidden),
        # variational heads fused: [W_mu | W_logvar]
        "W_head": jnp.concatenate([w_mu, w_lv], axis=1),
        "b_head": b(ks[11], 2 * latent_dim),
        # BiGAN generator
        "W_g1": w(ks[5], (latent_dim, g_hidden), latent_dim),
        "b_g1": b(ks[12], g_hidden),
        "W_g2": w(ks[6], (g_hidden, pix), g_hidden),
        "b_g2": b(ks[13], pix),
        # BiGAN encoder
        "W_e1": w(ks[7], (pix, e_hidden), pix),
        "b_e1": b(ks[14], e_hidden),
        "W_e2": w(ks[8], (e_hidden, latent_dim), e_hidden),
        "b_e2": b(ks[15], latent_dim),
        # nn.Parameter(torch.Tensor([0.0])) — unused in forward
        "log_scale": jnp.zeros((1,), jnp.float32),
    }


def pack_params(params):
    """Pack 17 individual tensors into 3 kernel operands (done once, offline)."""
    w128 = [params["W_emb"], params["W_ih"], params["W_hh"],
            params["W_head"], params["W_g1"], params["W_e1"]]
    width = w128[0].shape[1]
    assert all(w.shape[1] == width for w in w128), \
        "row-stacked weights must share the same (lane-dense) column width"
    assert params["W_g2"].shape[0] == params["W_e2"].shape[0], \
        "column-stacked output weights must share the same row count"
    W_cat = jnp.concatenate(w128, axis=0)                       # (sum_rows, 128)
    W_out = jnp.concatenate([params["W_g2"], params["W_e2"]], axis=1)
    b_cat = jnp.concatenate(
        [params["b_emb"], params["b_lstm"], params["b_head"], params["b_g1"],
         params["b_g2"], params["b_e1"], params["b_e2"]], axis=1)
    return {"W_cat": W_cat, "W_out": W_out, "b_cat": b_cat}


# ----------------------------------------------------------------------------
# Forward wrapper: one-time batch pad, single pallas_call, slice back.
# ----------------------------------------------------------------------------
def lstm_ssuperbigan_forward(packed, x, y, eps, *, seq_emb, lstm_hidden,
                             latent_dim, g_hidden, e_hidden):
    """x: (B, T, C, H, W), y: (B, C, H, W), eps: (B, latent_dim)."""
    B, T, C, Himg, Wimg = x.shape
    pix = C * Himg * Wimg
    Bp = -(-B // 8) * 8  # pad batch once to the 8-sublane granule

    x_seq = jnp.transpose(x, (1, 0, 2, 3, 4)).reshape(T, B, pix).astype(jnp.float32)
    x_seq = jnp.pad(x_seq, ((0, 0), (0, Bp - B), (0, 0)))
    x2d = x_seq.reshape(T * Bp, pix)            # time-major, frames on rows
    y_flat = jnp.pad(y.reshape(B, pix).astype(jnp.float32),
                     ((0, Bp - B), (0, 0)))
    eps_p = jnp.pad(eps.astype(jnp.float32), ((0, Bp - B), (0, 0)))

    kernel = functools.partial(
        _forward_kernel, T=T, Bp=Bp, pix=pix, seq_emb=seq_emb,
        hidden=lstm_hidden, latent=latent_dim,
        g_hidden=g_hidden, e_hidden=e_hidden)

    # Single whole-array VMEM-resident pallas_call (no grid): 6 operands,
    # ~1.5 MiB f32 total — fits comfortably on v5e/v6e/v7x.
    # TODO(synk): once batch grows, add a grid over Bp with
    #             dimension_semantics=("parallel",) (both v7x TensorCores) and
    #             re-derive block sizes for v7x's 64 MiB VMEM
    #             (pltpu.CompilerParams(vmem_limit_bytes=...)).
    y_rec_flat, small = pl.pallas_call(
        kernel,
        out_shape=(
            jax.ShapeDtypeStruct((Bp, pix), jnp.float32),
            jax.ShapeDtypeStruct((Bp, 4 * latent_dim), jnp.float32),
        ),
    )(x2d, y_flat, eps_p, packed["W_cat"], packed["W_out"], packed["b_cat"])

    L = latent_dim
    y_recon = y_rec_flat[:B].reshape(B, C, Himg, Wimg)
    z = small[:B, 0:L]
    mu = small[:B, L:2 * L]
    std = small[:B, 2 * L:3 * L]
    z_recon = small[:B, 3 * L:4 * L]
    return y_recon, z_recon, (z, mu, std)


# ----------------------------------------------------------------------------
# Pure-JAX reference (correctness check only; HIGHEST matmul precision so the
# f32-vs-f32 comparison can be tight).
# ----------------------------------------------------------------------------
def reference_forward(params, x, y, eps, *, lstm_hidden, latent_dim):
    dot = functools.partial(jnp.dot, precision=jax.lax.Precision.HIGHEST)
    B, T, C, Himg, Wimg = x.shape
    pix = C * Himg * Wimg
    xf = x.reshape(B, T, pix).astype(jnp.float32)
    emb = jnp.maximum(dot(xf, params["W_emb"]) + params["b_emb"], 0.0)
    h = jnp.zeros((B, lstm_hidden), jnp.float32)
    c = jnp.zeros((B, lstm_hidden), jnp.float32)
    for t in range(T):
        gates = (dot(emb[:, t], params["W_ih"]) + dot(h, params["W_hh"])
                 + params["b_lstm"])
        i_g = jax.nn.sigmoid(gates[:, 0 * lstm_hidden:1 * lstm_hidden])
        f_g = jax.nn.sigmoid(gates[:, 1 * lstm_hidden:2 * lstm_hidden])
        g_g = jnp.tanh(gates[:, 2 * lstm_hidden:3 * lstm_hidden])
        o_g = jax.nn.sigmoid(gates[:, 3 * lstm_hidden:4 * lstm_hidden])
        c = f_g * c + i_g * g_g
        h = o_g * jnp.tanh(c)
    head = dot(h, params["W_head"]) + params["b_head"]
    mu = head[:, :latent_dim]
    logvar = head[:, latent_dim:]
    std = jnp.exp(0.5 * logvar)
    z = mu + std * eps
    g1 = jnp.maximum(dot(z, params["W_g1"]) + params["b_g1"], 0.0)
    y_rec = jnp.tanh(dot(g1, params["W_g2"]) + params["b_g2"]).reshape(
        B, C, Himg, Wimg)
    e1 = jnp.maximum(dot(y.reshape(B, pix), params["W_e1"]) + params["b_e1"], 0.0)
    z_rec = dot(e1, params["W_e2"]) + params["b_e2"]
    return y_rec, z_rec, (z, mu, std)


# ----------------------------------------------------------------------------
if __name__ == "__main__":
    B, T = 2, 4
    C, HW = 3, 16            # image_channel=3, image_dim=16 -> pix = 768
    SEQ_EMB = 128            # frame embedding dim (LSTM input size)
    LSTM_HIDDEN = 32         # 4*H = 128 gate lanes
    LATENT = 64              # mu|logvar head = 128 lanes
    G_HIDDEN = 128
    E_HIDDEN = 128

    root = jax.random.PRNGKey(0)
    k_param, k_x, k_y, k_eps = jax.random.split(root, 4)

    params = init_params(
        k_param, image_dim=HW, image_channel=C, seq_emb=SEQ_EMB,
        lstm_hidden=LSTM_HIDDEN, latent_dim=LATENT,
        g_hidden=G_HIDDEN, e_hidden=E_HIDDEN,
    )
    packed = pack_params(params)   # once, outside the jitted forward

    x = jax.random.normal(k_x, (B, T, C, HW, HW), jnp.float32)
    y = jax.random.normal(k_y, (B, C, HW, HW), jnp.float32)
    eps = jax.random.normal(k_eps, (B, LATENT), jnp.float32)

    fwd = jax.jit(functools.partial(
        lstm_ssuperbigan_forward, seq_emb=SEQ_EMB, lstm_hidden=LSTM_HIDDEN,
        latent_dim=LATENT, g_hidden=G_HIDDEN, e_hidden=E_HIDDEN))
    y_recon, z_recon, (z, mu, std) = fwd(packed, x, y, eps)
    jax.block_until_ready((y_recon, z_recon, z, mu, std))

    # shape checks
    assert y_recon.shape == (B, C, HW, HW)
    assert z_recon.shape == (B, LATENT)
    assert z.shape == mu.shape == std.shape == (B, LATENT)

    # numerical check against the pure-JAX f32 reference (tightened from the
    # previous 5e-2: f32 matmuls on both sides agree to ~1e-5; 1e-4 leaves
    # margin for MXU multi-pass rounding while still catching semantic bugs).
    ry, rz, (rzz, rmu, rstd) = reference_forward(
        params, x, y, eps, lstm_hidden=LSTM_HIDDEN, latent_dim=LATENT)
    for name, got, want in (("y_recon", y_recon, ry), ("z_recon", z_recon, rz),
                            ("z", z, rzz), ("mu", mu, rmu), ("std", std, rstd)):
        err = float(jnp.max(jnp.abs(got - want)))
        assert bool(jnp.allclose(got, want, atol=1e-4, rtol=1e-4)), (name, err)

    print("KERNEL_OK")
</pallas_src>

<mosaic_0001>
module attributes {stable_mosaic.version = 11 : i64} {
  func.func @_forward_kernel(%arg0: memref<32x768xf32, #tpu.memory_space<vmem>>, %arg1: memref<8x768xf32, #tpu.memory_space<vmem>>, %arg2: memref<8x64xf32, #tpu.memory_space<vmem>>, %arg3: memref<1792x128xf32, #tpu.memory_space<vmem>>, %arg4: memref<128x832xf32, #tpu.memory_space<vmem>>, %arg5: memref<1x1472xf32, #tpu.memory_space<vmem>>, %arg6: memref<8x768xf32, #tpu.memory_space<vmem>>, %arg7: memref<8x256xf32, #tpu.memory_space<vmem>>) attributes {dimension_semantics = [], scalar_prefetch = 0 : i64, scratch_operands = 0 : i64, tpu.core_type = #tpu.core_type<tc>} {
    %c0 = arith.constant 0 : index
    %c0_0 = arith.constant 0 : index
    %0 = vector.load %arg0[%c0, %c0_0] : memref<32x768xf32, #tpu.memory_space<vmem>>, vector<32x768xf32>
    %c0_1 = arith.constant 0 : index
    %c0_2 = arith.constant 0 : index
    %1 = vector.load %arg3[%c0_1, %c0_2] : memref<1792x128xf32, #tpu.memory_space<vmem>>, vector<768x128xf32>
    %cst = arith.constant dense<0.000000e+00> : vector<32x128xf32>
    %2 = tpu.matmul %0, %1, %cst {dimension_numbers = #tpu.dot_dimension_numbers<[1], [0], [0], [1], [0, 0, 1, 1], [], []>} : vector<32x768xf32>, vector<768x128xf32>, vector<32x128xf32> -> vector<32x128xf32>
    %c0_3 = arith.constant 0 : index
    %c0_4 = arith.constant 0 : index
    %3 = vector.load %arg5[%c0_3, %c0_4] : memref<1x1472xf32, #tpu.memory_space<vmem>>, vector<1x128xf32>
    %4 = vector.broadcast %3 : vector<1x128xf32> to vector<32x128xf32>
    %5 = arith.addf %2, %4 : vector<32x128xf32>
    %cst_5 = arith.constant 0.000000e+00 : f32
    %6 = vector.broadcast %cst_5 : f32 to vector<32x128xf32>
    %7 = arith.maximumf %5, %6 : vector<32x128xf32>
    %c768 = arith.constant 768 : index
    %c0_6 = arith.constant 0 : index
    %8 = vector.load %arg3[%c768, %c0_6] : memref<1792x128xf32, #tpu.memory_space<vmem>>, vector<128x128xf32>
    %cst_7 = arith.constant dense<0.000000e+00> : vector<32x128xf32>
    %9 = tpu.matmul %7, %8, %cst_7 {dimension_numbers = #tpu.dot_dimension_numbers<[1], [0], [0], [1], [0, 0, 1, 1], [], []>} : vector<32x128xf32>, vector<128x128xf32>, vector<32x128xf32> -> vector<32x128xf32>
    %c0_8 = arith.constant 0 : index
    %c128 = arith.constant 128 : index
    %10 = vector.load %arg5[%c0_8, %c128] : memref<1x1472xf32, #tpu.memory_space<vmem>>, vector<1x128xf32>
    %11 = vector.broadcast %10 : vector<1x128xf32> to vector<32x128xf32>
    %12 = arith.addf %9, %11 : vector<32x128xf32>
    %c896 = arith.constant 896 : index
    %c0_9 = arith.constant 0 : index
    %13 = vector.load %arg3[%c896, %c0_9] : memref<1792x128xf32, #tpu.memory_space<vmem>>, vector<32x128xf32>
    %cst_10 = arith.constant 0.000000e+00 : f32
    %14 = vector.broadcast %cst_10 : f32 to vector<8x32xf32>
    %cst_11 = arith.constant 0.000000e+00 : f32
    %15 = vector.broadcast %cst_11 : f32 to vector<8x32xf32>
    %16 = vector.extract_strided_slice %12 {offsets = [0, 0], sizes = [8, 128], strides = [1, 1]} : vector<32x128xf32> to vector<8x128xf32>
    %cst_12 = arith.constant dense<0.000000e+00> : vector<8x128xf32>
    %17 = tpu.matmul %14, %13, %cst_12 {dimension_numbers = #tpu.dot_dimension_numbers<[1], [0], [0], [1], [0, 0, 1, 1], [], []>} : vector<8x32xf32>, vector<32x128xf32>, vector<8x128xf32> -> vector<8x128xf32>
    %18 = arith.addf %16, %17 : vector<8x128xf32>
    %19 = arith.negf %18 : vector<8x128xf32>
    %20 = math.exp %19 : vector<8x128xf32>
    %cst_13 = arith.constant 1.000000e+00 : f32
    %21 = vector.broadcast %cst_13 : f32 to vector<8x128xf32>
    %22 = arith.addf %21, %20 : vector<8x128xf32>
    %23 = arith.divf %21, %22 : vector<8x128xf32>
    %24 = math.tanh %18 : vector<8x128xf32>
    %25 = vector.extract_strided_slice %23 {offsets = [0, 0], sizes = [8, 32], strides = [1, 1]} : vector<8x128xf32> to vector<8x32xf32>
    %26 = vector.extract_strided_slice %23 {offsets = [0, 32], sizes = [8, 32], strides = [1, 1]} : vector<8x128xf32> to vector<8x32xf32>
    %27 = vector.extract_strided_slice %24 {offsets = [0, 64], sizes = [8, 32], strides = [1, 1]} : vector<8x128xf32> to vector<8x32xf32>
    %28 = vector.extract_strided_slice %23 {offsets = [0, 96], sizes = [8, 32], strides = [1, 1]} : vector<8x128xf32> to vector<8x32xf32>
    %29 = arith.mulf %26, %15 : vector<8x32xf32>
    %30 = arith.mulf %25, %27 : vector<8x32xf32>
    %31 = arith.addf %29, %30 : vector<8x32xf32>
    %32 = math.tanh %31 : vector<8x32xf32>
    %33 = arith.mulf %28, %32 : vector<8x32xf32>
    %34 = vector.extract_strided_slice %12 {offsets = [8, 0], sizes = [8, 128], strides = [1, 1]} : vector<32x128xf32> to vector<8x128xf32>
    %cst_14 = arith.constant dense<0.000000e+00> : vector<8x128xf32>
    %35 = tpu.matmul %33, %13, %cst_14 {dimension_numbers = #tpu.dot_dimension_numbers<[1], [0], [0], [1], [0, 0, 1, 1], [], []>} : vector<8x32xf32>, vector<32x128xf32>, vector<8x128xf32> -> vector<8x128xf32>
    %36 = arith.addf %34, %35 : vector<8x128xf32>
    %37 = arith.negf %36 : vector<8x128xf32>
    %38 = math.exp %37 : vector<8x128xf32>
    %cst_15 = arith.constant 1.000000e+00 : f32
    %39 = vector.broadcast %cst_15 : f32 to vector<8x128xf32>
    %40 = arith.addf %39, %38 : vector<8x128xf32>
    %41 = arith.divf %39, %40 : vector<8x128xf32>
    %42 = math.tanh %36 : vector<8x128xf32>
    %43 = vector.extract_strided_slice %41 {offsets = [0, 0], sizes = [8, 32], strides = [1, 1]} : vector<8x128xf32> to vector<8x32xf32>
    %44 = vector.extract_strided_slice %41 {offsets = [0, 32], sizes = [8, 32], strides = [1, 1]} : vector<8x128xf32> to vector<8x32xf32>
    %45 = vector.extract_strided_slice %42 {offsets = [0, 64], sizes = [8, 32], strides = [1, 1]} : vector<8x128xf32> to vector<8x32xf32>
    %46 = vector.extract_strided_slice %41 {offsets = [0, 96], sizes = [8, 32], strides = [1, 1]} : vector<8x128xf32> to vector<8x32xf32>
    %47 = arith.mulf %44, %31 : vector<8x32xf32>
    %48 = arith.mulf %43, %45 : vector<8x32xf32>
    %49 = arith.addf %47, %48 : vector<8x32xf32>
    %50 = math.tanh %49 : vector<8x32xf32>
    %51 = arith.mulf %46, %50 : vector<8x32xf32>
    %52 = vector.extract_strided_slice %12 {offsets = [16, 0], sizes = [8, 128], strides = [1, 1]} : vector<32x128xf32> to vector<8x128xf32>
    %cst_16 = arith.constant dense<0.000000e+00> : vector<8x128xf32>
    %53 = tpu.matmul %51, %13, %cst_16 {dimension_numbers = #tpu.dot_dimension_numbers<[1], [0], [0], [1], [0, 0, 1, 1], [], []>} : vector<8x32xf32>, vector<32x128xf32>, vector<8x128xf32> -> vector<8x128xf32>
    %54 = arith.addf %52, %53 : vector<8x128xf32>
    %55 = arith.negf %54 : vector<8x128xf32>
    %56 = math.exp %55 : vector<8x128xf32>
    %cst_17 = arith.constant 1.000000e+00 : f32
    %57 = vector.broadcast %cst_17 : f32 to vector<8x128xf32>
    %58 = arith.addf %57, %56 : vector<8x128xf32>
    %59 = arith.divf %57, %58 : vector<8x128xf32>
    %60 = math.tanh %54 : vector<8x128xf32>
    %61 = vector.extract_strided_slice %59 {offsets = [0, 0], sizes = [8, 32], strides = [1, 1]} : vector<8x128xf32> to vector<8x32xf32>
    %62 = vector.extract_strided_slice %59 {offsets = [0, 32], sizes = [8, 32], strides = [1, 1]} : vector<8x128xf32> to vector<8x32xf32>
    %63 = vector.extract_strided_slice %60 {offsets = [0, 64], sizes = [8, 32], strides = [1, 1]} : vector<8x128xf32> to vector<8x32xf32>
    %64 = vector.extract_strided_slice %59 {offsets = [0, 96], sizes = [8, 32], strides = [1, 1]} : vector<8x128xf32> to vector<8x32xf32>
    %65 = arith.mulf %62, %49 : vector<8x32xf32>
    %66 = arith.mulf %61, %63 : vector<8x32xf32>
    %67 = arith.addf %65, %66 : vector<8x32xf32>
    %68 = math.tanh %67 : vector<8x32xf32>
    %69 = arith.mulf %64, %68 : vector<8x32xf32>
    %70 = vector.extract_strided_slice %12 {offsets = [24, 0], sizes = [8, 128], strides = [1, 1]} : vector<32x128xf32> to vector<8x128xf32>
    %cst_18 = arith.constant dense<0.000000e+00> : vector<8x128xf32>
    %71 = tpu.matmul %69, %13, %cst_18 {dimension_numbers = #tpu.dot_dimension_numbers<[1], [0], [0], [1], [0, 0, 1, 1], [], []>} : vector<8x32xf32>, vector<32x128xf32>, vector<8x128xf32> -> vector<8x128xf32>
    %72 = arith.addf %70, %71 : vector<8x128xf32>
    %73 = arith.negf %72 : vector<8x128xf32>
    %74 = math.exp %73 : vector<8x128xf32>
    %cst_19 = arith.constant 1.000000e+00 : f32
    %75 = vector.broadcast %cst_19 : f32 to vector<8x128xf32>
    %76 = arith.addf %75, %74 : vector<8x128xf32>
    %77 = arith.divf %75, %76 : vector<8x128xf32>
    %78 = math.tanh %72 : vector<8x128xf32>
    %79 = vector.extract_strided_slice %77 {offsets = [0, 0], sizes = [8, 32], strides = [1, 1]} : vector<8x128xf32> to vector<8x32xf32>
    %80 = vector.extract_strided_slice %77 {offsets = [0, 32], sizes = [8, 32], strides = [1, 1]} : vector<8x128xf32> to vector<8x32xf32>
    %81 = vector.extract_strided_slice %78 {offsets = [0, 64], sizes = [8, 32], strides = [1, 1]} : vector<8x128xf32> to vector<8x32xf32>
    %82 = vector.extract_strided_slice %77 {offsets = [0, 96], sizes = [8, 32], strides = [1, 1]} : vector<8x128xf32> to vector<8x32xf32>
    %83 = arith.mulf %80, %67 : vector<8x32xf32>
    %84 = arith.mulf %79, %81 : vector<8x32xf32>
    %85 = arith.addf %83, %84 : vector<8x32xf32>
    %86 = math.tanh %85 : vector<8x32xf32>
    %87 = arith.mulf %82, %86 : vector<8x32xf32>
    %c928 = arith.constant 928 : index
    %c0_20 = arith.constant 0 : index
    %88 = vector.load %arg3[%c928, %c0_20] : memref<1792x128xf32, #tpu.memory_space<vmem>>, vector<32x128xf32>
    %cst_21 = arith.constant dense<0.000000e+00> : vector<8x128xf32>
    %89 = tpu.matmul %87, %88, %cst_21 {dimension_numbers = #tpu.dot_dimension_numbers<[1], [0], [0], [1], [0, 0, 1, 1], [], []>} : vector<8x32xf32>, vector<32x128xf32>, vector<8x128xf32> -> vector<8x128xf32>
    %c0_22 = arith.constant 0 : index
    %c256 = arith.constant 256 : index
    %90 = vector.load %arg5[%c0_22, %c256] : memref<1x1472xf32, #tpu.memory_space<vmem>>, vector<1x128xf32>
    %91 = vector.broadcast %90 : vector<1x128xf32> to vector<8x128xf32>
    %92 = arith.addf %89, %91 : vector<8x128xf32>
    %93 = vector.extract_strided_slice %92 {offsets = [0, 0], sizes = [8, 64], strides = [1, 1]} : vector<8x128xf32> to vector<8x64xf32>
    %94 = vector.extract_strided_slice %92 {offsets = [0, 64], sizes = [8, 64], strides = [1, 1]} : vector<8x128xf32> to vector<8x64xf32>
    %cst_23 = arith.constant 5.000000e-01 : f32
    %95 = vector.broadcast %cst_23 : f32 to vector<8x64xf32>
    %96 = arith.mulf %95, %94 : vector<8x64xf32>
    %97 = math.exp %96 : vector<8x64xf32>
    %c0_24 = arith.constant 0 : index
    %c0_25 = arith.constant 0 : index
    %98 = vector.load %arg2[%c0_24, %c0_25] : memref<8x64xf32, #tpu.memory_space<vmem>>, vector<8x64xf32>
    %99 = arith.mulf %97, %98 : vector<8x64xf32>
    %100 = arith.addf %93, %99 : vector<8x64xf32>
    %c960 = arith.constant 960 : index
    %c0_26 = arith.constant 0 : index
    %101 = vector.load %arg3[%c960, %c0_26] : memref<1792x128xf32, #tpu.memory_space<vmem>>, vector<64x128xf32>
    %cst_27 = arith.constant dense<0.000000e+00> : vector<8x128xf32>
    %102 = tpu.matmul %100, %101, %cst_27 {dimension_numbers = #tpu.dot_dimension_numbers<[1], [0], [0], [1], [0, 0, 1, 1], [], []>} : vector<8x64xf32>, vector<64x128xf32>, vector<8x128xf32> -> vector<8x128xf32>
    %c0_28 = arith.constant 0 : index
    %c384 = arith.constant 384 : index
    %103 = vector.load %arg5[%c0_28, %c384] : memref<1x1472xf32, #tpu.memory_space<vmem>>, vector<1x128xf32>
    %104 = vector.broadcast %103 : vector<1x128xf32> to vector<8x128xf32>
    %105 = arith.addf %102, %104 : vector<8x128xf32>
    %cst_29 = arith.constant 0.000000e+00 : f32
    %106 = vector.broadcast %cst_29 : f32 to vector<8x128xf32>
    %107 = arith.maximumf %105, %106 : vector<8x128xf32>
    %c0_30 = arith.constant 0 : index
    %c0_31 = arith.constant 0 : index
    %108 = vector.load %arg4[%c0_30, %c0_31] : memref<128x832xf32, #tpu.memory_space<vmem>>, vector<128x768xf32>
    %cst_32 = arith.constant dense<0.000000e+00> : vector<8x768xf32>
    %109 = tpu.matmul %107, %108, %cst_32 {dimension_numbers = #tpu.dot_dimension_numbers<[1], [0], [0], [1], [0, 0, 1, 1], [], []>} : vector<8x128xf32>, vector<128x768xf32>, vector<8x768xf32> -> vector<8x768xf32>
    %c0_33 = arith.constant 0 : index
    %c512 = arith.constant 512 : index
    %110 = vector.load %arg5[%c0_33, %c512] : memref<1x1472xf32, #tpu.memory_space<vmem>>, vector<1x768xf32>
    %111 = vector.broadcast %110 : vector<1x768xf32> to vector<8x768xf32>
    %112 = arith.addf %109, %111 : vector<8x768xf32>
    %113 = math.tanh %112 : vector<8x768xf32>
    %c0_34 = arith.constant 0 : index
    %c0_35 = arith.constant 0 : index
    %114 = vector.load %arg1[%c0_34, %c0_35] : memref<8x768xf32, #tpu.memory_space<vmem>>, vector<8x768xf32>
    %c1024 = arith.constant 1024 : index
    %c0_36 = arith.constant 0 : index
    %115 = vector.load %arg3[%c1024, %c0_36] : memref<1792x128xf32, #tpu.memory_space<vmem>>, vector<768x128xf32>
    %cst_37 = arith.constant dense<0.000000e+00> : vector<8x128xf32>
    %116 = tpu.matmul %114, %115, %cst_37 {dimension_numbers = #tpu.dot_dimension_numbers<[1], [0], [0], [1], [0, 0, 1, 1], [], []>} : vector<8x768xf32>, vector<768x128xf32>, vector<8x128xf32> -> vector<8x128xf32>
    %c0_38 = arith.constant 0 : index
    %c1280 = arith.constant 1280 : index
    %117 = vector.load %arg5[%c0_38, %c1280] : memref<1x1472xf32, #tpu.memory_space<vmem>>, vector<1x128xf32>
    %118 = vector.broadcast %117 : vector<1x128xf32> to vector<8x128xf32>
    %119 = arith.addf %116, %118 : vector<8x128xf32>
    %cst_39 = arith.constant 0.000000e+00 : f32
    %120 = vector.broadcast %cst_39 : f32 to vector<8x128xf32>
    %121 = arith.maximumf %119, %120 : vector<8x128xf32>
    %c0_40 = arith.constant 0 : index
    %c768_41 = arith.constant 768 : index
    %122 = vector.load %arg4[%c0_40, %c768_41] : memref<128x832xf32, #tpu.memory_space<vmem>>, vector<128x64xf32>
    %cst_42 = arith.constant dense<0.000000e+00> : vector<8x64xf32>
    %123 = tpu.matmul %121, %122, %cst_42 {dimension_numbers = #tpu.dot_dimension_numbers<[1], [0], [0], [1], [0, 0, 1, 1], [], []>} : vector<8x128xf32>, vector<128x64xf32>, vector<8x64xf32> -> vector<8x64xf32>
    %c0_43 = arith.constant 0 : index
    %c1408 = arith.constant 1408 : index
    %124 = vector.load %arg5[%c0_43, %c1408] : memref<1x1472xf32, #tpu.memory_space<vmem>>, vector<1x64xf32>
    %125 = vector.broadcast %124 : vector<1x64xf32> to vector<8x64xf32>
    %126 = arith.addf %123, %125 : vector<8x64xf32>
    %c0_44 = arith.constant 0 : index
    %c0_45 = arith.constant 0 : index
    %127 = vector.load %arg6[%c0_44, %c0_45] : memref<8x768xf32, #tpu.memory_space<vmem>>, vector<8x768xf32>
    tpu.vector_store %arg6[%c0_44, %c0_45], %113 {strides = array<i32>} : memref<8x768xf32, #tpu.memory_space<vmem>>, vector<8x768xf32>,
    %128 = tpu.concatenate %100, %93, %97, %126 in 1 : vector<8x64xf32>, vector<8x64xf32>, vector<8x64xf32>, vector<8x64xf32> -> vector<8x256xf32>
    %c0_46 = arith.constant 0 : index
    %c0_47 = arith.constant 0 : index
    %129 = vector.load %arg7[%c0_46, %c0_47] : memref<8x256xf32, #tpu.memory_space<vmem>>, vector<8x256xf32>
    tpu.vector_store %arg7[%c0_46, %c0_47], %128 {strides = array<i32>} : memref<8x256xf32, #tpu.memory_space<vmem>>, vector<8x256xf32>,
    return
  }
}

</mosaic_0001>

<bundles_post_ra>
// kernel: lstm_ssuperbigan_forward.1
= control target key start
LH: loop header
LB: loop body
LE: loop exit
PB: predicated region body
PF: predicated region fallthrough
CT: control target
= control target key end

     0   :  { %vm2423_vm0 = vmmov 0   ;;  %s2424_s30 = smov 64   ;;  %s2425_s8 = smov 32   ;;  %vm523_vm1 = vcmask 261120   ;;  %vm1037_vm2 = vcmask 523264   ;;  %s3745_s3 = inlined_call_operand.vmem [shape: f32[1792,128], index: 3, kind: input, shape index: {}]   ;;  %s3746_s0 = inlined_call_operand.vmem [shape: f32[32,768], index: 0, kind: input, shape index: {}]   ;;  %s3747_s5 = inlined_call_operand.vmem [shape: f32[1,1472], index: 5, kind: input, shape index: {}]   ;;  %s3748_s2 = inlined_call_operand.vmem [shape: f32[8,64], index: 2, kind: input, shape index: {}]   ;;  %s3749_s4 = inlined_call_operand.vmem [shape: f32[128,832], index: 4, kind: input, shape index: {}]   ;;  %s3750_s7 = inlined_call_operand.vmem [shape: f32[8,256], index: 7, kind: output, shape index: {1}]   ;;  %s3751_s1 = inlined_call_operand.vmem [shape: f32[8,768], index: 1, kind: input, shape index: {}]   ;;  %s3752_s6 = inlined_call_operand.vmem [shape: f32[8,768], index: 6, kind: output, shape index: {0}]  }
   0x1   :  { %v80_v0 = vld [vmem:[%s3745_s3 + $0xf8] sm:$0xff]  ;;  %v79_v2 = vld [vmem:[%s3745_s3 + $0xf0] sm:$0xff]  ;;  %v78_v6 = vld [vmem:[%s3745_s3 + $0xe8] sm:$0xff] }
   0x2   :  { %v64_v1 = vld [vmem:[%s3745_s3 + $0x78] sm:$0xff]  ;;  %1917 = vmatprep.subr.mxu0 %v80_v0  ;;  %v63_v4 = vld [vmem:[%s3745_s3 + $0x70] sm:$0xff]  ;;  %v62_v8 = vld [vmem:[%s3745_s3 + $0x68] sm:$0xff] }
   0x3   :  { %v112_v3 = vld [vmem:[%s3745_s3 + $0x1f8] sm:$0xff]  ;;  %1918 = vmatpush3.msra.mxu0 %v64_v1  ;;  %v111_v7 = vld [vmem:[%s3745_s3 + $0x1f0] sm:$0xff]  ;;  %v110_v10 = vld [vmem:[%s3745_s3 + $0x1e8] sm:$0xff] }
   0x4   :  { %v96_v5 = vld [vmem:[%s3745_s3 + $0x178] sm:$0xff]  ;;  %1961 = vmatprep.subr.mxu1 %v112_v3  ;;  %1919 = vmatprep.subr.mxu0 %v79_v2  ;;  %v95_v9 = vld [vmem:[%s3745_s3 + $0x170] sm:$0xff]  ;;  %v77_v11 = vld [vmem:[%s3745_s3 + $0xe0] sm:$0xff] }
   0x5   :  { %1962 = vmatpush3.msra.mxu1 %v96_v5  ;;  %1920 = vmatpush3.msra.mxu0 %v63_v4  ;;  %v94_v12 = vld [vmem:[%s3745_s3 + $0x168] sm:$0xff]  ;;  %v61_v13 = vld [vmem:[%s3745_s3 + $0x60] sm:$0xff]  ;;  %v76_v15 = vld [vmem:[%s3745_s3 + $0xd8] sm:$0xff] }
   0x6   :  { %1963 = vmatprep.subr.mxu1 %v111_v7  ;;  %1921 = vmatprep.subr.mxu0 %v78_v6  ;;  %v109_v14 = vld [vmem:[%s3745_s3 + $0x1e0] sm:$0xff]  ;;  %v60_v17 = vld [vmem:[%s3745_s3 + $0x58] sm:$0xff]  ;;  %v75_v19 = vld [vmem:[%s3745_s3 + $0xd0] sm:$0xff] }
   0x7   :  { %1964 = vmatpush3.msra.mxu1 %v95_v9  ;;  %1922 = vmatpush3.msra.mxu0 %v62_v8  ;;  %v93_v16 = vld [vmem:[%s3745_s3 + $0x160] sm:$0xff]  ;;  %v108_v18 = vld [vmem:[%s3745_s3 + $0x1d8] sm:$0xff]  ;;  %v59_v21 = vld [vmem:[%s3745_s3 + $0x50] sm:$0xff] }
   0x8   :  { %1965 = vmatprep.subr.mxu1 %v110_v10  ;;  %1923 = vmatprep.subr.mxu0 %v77_v11  ;;  %v92_v20 = vld [vmem:[%s3745_s3 + $0x158] sm:$0xff]  ;;  %v107_v22 = vld [vmem:[%s3745_s3 + $0x1d0] sm:$0xff]  ;;  %v74_v23 = vld [vmem:[%s3745_s3 + $0xc8] sm:$0xff] }
   0x9   :  { %1966 = vmatpush3.msra.mxu1 %v94_v12  ;;  %1924 = vmatpush3.msra.mxu0 %v61_v13  ;;  %v91_v24 = vld [vmem:[%s3745_s3 + $0x150] sm:$0xff]  ;;  %v58_v25 = vld [vmem:[%s3745_s3 + $0x48] sm:$0xff]  ;;  %v73_v27 = vld [vmem:[%s3745_s3 + $0xc0] sm:$0xff] }
   0xa   :  { %1967 = vmatprep.subr.mxu1 %v109_v14  ;;  %1925 = vmatprep.subr.mxu0 %v76_v15  ;;  %v106_v26 = vld [vmem:[%s3745_s3 + $0x1c8] sm:$0xff]  ;;  %v57_v29 = vld [vmem:[%s3745_s3 + $0x40] sm:$0xff]  ;;  %v72_v31 = vld [vmem:[%s3745_s3 + $0xb8] sm:$0xff] }
   0xb   :  { %1968 = vmatpush3.msra.mxu1 %v93_v16  ;;  %1926 = vmatpush3.msra.mxu0 %v60_v17  ;;  %v90_v28 = vld [vmem:[%s3745_s3 + $0x148] sm:$0xff]  ;;  %v105_v30 = vld [vmem:[%s3745_s3 + $0x1c0] sm:$0xff]  ;;  %v56_v33 = vld [vmem:[%s3745_s3 + $0x38] sm:$0xff] }
   0xc   :  { %1969 = vmatprep.subr.mxu1 %v108_v18  ;;  %1927 = vmatprep.subr.mxu0 %v75_v19  ;;  %v89_v32 = vld [vmem:[%s3745_s3 + $0x140] sm:$0xff]  ;;  %v104_v34 = vld [vmem:[%s3745_s3 + $0x1b8] sm:$0xff]  ;;  %v71_v35 = vld [vmem:[%s3745_s3 + $0xb0] sm:$0xff] }
   0xd   :  { %1970 = vmatpush3.msra.mxu1 %v92_v20  ;;  %1928 = vmatpush3.msra.mxu0 %v59_v21  ;;  %v88_v36 = vld [vmem:[%s3745_s3 + $0x138] sm:$0xff]  ;;  %v55_v37 = vld [vmem:[%s3745_s3 + $0x30] sm:$0xff]  ;;  %v70_v39 = vld [vmem:[%s3745_s3 + $0xa8] sm:$0xff] }
   0xe   :  { %1971 = vmatprep.subr.mxu1 %v107_v22  ;;  %1929 = vmatprep.subr.mxu0 %v74_v23  ;;  %v103_v38 = vld [vmem:[%s3745_s3 + $0x1b0] sm:$0xff]  ;;  %v54_v41 = vld [vmem:[%s3745_s3 + $0x28] sm:$0xff]  ;;  %v69_v43 = vld [vmem:[%s3745_s3 + $0xa0] sm:$0xff] }
   0xf   :  { %1972 = vmatpush3.msra.mxu1 %v91_v24  ;;  %1930 = vmatpush3.msra.mxu0 %v58_v25  ;;  %v87_v40 = vld [vmem:[%s3745_s3 + $0x130] sm:$0xff]  ;;  %v102_v42 = vld [vmem:[%s3745_s3 + $0x1a8] sm:$0xff]  ;;  %v53_v45 = vld [vmem:[%s3745_s3 + $0x20] sm:$0xff] }
  0x10   :  { %1973 = vmatprep.subr.mxu1 %v106_v26  ;;  %1931 = vmatprep.subr.mxu0 %v73_v27  ;;  %v86_v44 = vld [vmem:[%s3745_s3 + $0x128] sm:$0xff]  ;;  %v101_v46 = vld [vmem:[%s3745_s3 + $0x1a0] sm:$0xff]  ;;  %v68_v47 = vld [vmem:[%s3745_s3 + $0x98] sm:$0xff] }
  0x11   :  { %1974 = vmatpush3.msra.mxu1 %v90_v28  ;;  %1932 = vmatpush3.msra.mxu0 %v57_v29  ;;  %v85_v48 = vld [vmem:[%s3745_s3 + $0x120] sm:$0xff]  ;;  %v52_v49 = vld [vmem:[%s3745_s3 + $0x18] sm:$0xff]  ;;  %v67_v51 = vld [vmem:[%s3745_s3 + $0x90] sm:$0xff] }
  0x12   :  { %1975 = vmatprep.subr.mxu1 %v105_v30  ;;  %1933 = vmatprep.subr.mxu0 %v72_v31  ;;  %v100_v50 = vld [vmem:[%s3745_s3 + $0x198] sm:$0xff]  ;;  %v51_v53 = vld [vmem:[%s3745_s3 + $0x10] sm:$0xff]  ;;  %v66_v55 = vld [vmem:[%s3745_s3 + $0x88] sm:$0xff] }
  0x13   :  { %1976 = vmatpush3.msra.mxu1 %v89_v32  ;;  %1934 = vmatpush3.msra.mxu0 %v56_v33  ;;  %v84_v52 = vld [vmem:[%s3745_s3 + $0x118] sm:$0xff]  ;;  %v99_v54 = vld [vmem:[%s3745_s3 + $0x190] sm:$0xff]  ;;  %v50_v57 = vld [vmem:[%s3745_s3 + $0x8] sm:$0xff] }
  0x14   :  { %1977 = vmatprep.subr.mxu1 %v104_v34  ;;  %1935 = vmatprep.subr.mxu0 %v71_v35  ;;  %v83_v56 = vld [vmem:[%s3745_s3 + $0x110] sm:$0xff]  ;;  %v98_v58 = vld [vmem:[%s3745_s3 + $0x188] sm:$0xff]  ;;  %v65_v59 = vld [vmem:[%s3745_s3 + $0x80] sm:$0xff] }
  0x15   :  { %1978 = vmatpush3.msra.mxu1 %v88_v36  ;;  %1936 = vmatpush3.msra.mxu0 %v55_v37  ;;  %v26_v60 = vld [vmem:[%s3746_s0 + $0x8] sm:$0xff]  ;;  %v49_v61 = vld [vmem:[%s3745_s3] sm:$0xff]  ;;  %v144_v1 = vld [vmem:[%s3745_s3 + $0x2f8] sm:$0xff] }
  0x16   :  { %1979 = vmatprep.subr.mxu1 %v103_v38  ;;  %1937 = vmatprep.subr.mxu0 %v70_v39  ;;  %v82_v62 = vld [vmem:[%s3745_s3 + $0x108] sm:$0xff]  ;;  %v25_v63 = vld [vmem:[%s3746_s0] sm:$0xff]  ;;  %v28_v3 = vld [vmem:[%s3746_s0 + $0x18] sm:$0xff] }
  0x17   :  { %1980 = vmatpush3.msra.mxu1 %v87_v40  ;;  %1938 = vmatpush3.msra.mxu0 %v54_v41  ;;  %v97_v0 = vld [vmem:[%s3745_s3 + $0x180] sm:$0xff]  ;;  %v128_v4 = vld [vmem:[%s3745_s3 + $0x278] sm:$0xff]  ;;  %v27_v5 = vld [vmem:[%s3746_s0 + $0x10] sm:$0xff] }
  0x18   :  { %1981 = vmatprep.subr.mxu1 %v102_v42  ;;  %1939 = vmatprep.subr.mxu0 %v69_v43  ;;  %v81_v2 = vld [vmem:[%s3745_s3 + $0x100] sm:$0xff]  ;;  %v143_v6 = vld [vmem:[%s3745_s3 + $0x2f0] sm:$0xff]  ;;  %v32_v8 = vld [vmem:[%s3746_s0 + $0x38] sm:$0xff] }
  0x19   :  { %1982 = vmatpush3.msra.mxu1 %v86_v44  ;;  %1940 = vmatpush3.msra.mxu0 %v53_v45  ;;  %v127_v7 = vld [vmem:[%s3745_s3 + $0x270] sm:$0xff]  ;;  %v142_v9 = vld [vmem:[%s3745_s3 + $0x2e8] sm:$0xff]  ;;  %v141_v13 = vld [vmem:[%s3745_s3 + $0x2e0] sm:$0xff] }
  0x1a   :  { %1983 = vmatprep.subr.mxu1 %v101_v46  ;;  %1941 = vmatprep.subr.mxu0 %v68_v47  ;;  %v31_v10 = vld [vmem:[%s3746_s0 + $0x30] sm:$0xff]  ;;  %v126_v11 = vld [vmem:[%s3745_s3 + $0x268] sm:$0xff]  ;;  %v33_v14 = vld [vmem:[%s3746_s0 + $0x40] sm:$0xff] }
  0x1b   :  { %1984 = vmatpush3.msra.mxu1 %v85_v48  ;;  %1942 = vmatpush3.msra.mxu0 %v52_v49  ;;  %v34_v12 = vld [vmem:[%s3746_s0 + $0x48] sm:$0xff]  ;;  %v125_v15 = vld [vmem:[%s3745_s3 + $0x260] sm:$0xff]  ;;  %v140_v17 = vld [vmem:[%s3745_s3 + $0x2d8] sm:$0xff] }
  0x1c   :  { %1985 = vmatprep.subr.mxu1 %v100_v50  ;;  %1943 = vmatprep.subr.mxu0 %v67_v51  ;;  %v38_v16 = vld [vmem:[%s3746_s0 + $0x68] sm:$0xff]  ;;  %v37_v18 = vld [vmem:[%s3746_s0 + $0x60] sm:$0xff]  ;;  %v124_v19 = vld [vmem:[%s3745_s3 + $0x258] sm:$0xff] }
  0x1d   :  { %1986 = vmatpush3.msra.mxu1 %v84_v52  ;;  %1944 = vmatpush3.msra.mxu0 %v51_v53  ;;  %v40_v20 = vld [vmem:[%s3746_s0 + $0x78] sm:$0xff]  ;;  %v139_v21 = vld [vmem:[%s3745_s3 + $0x2d0] sm:$0xff]  ;;  %v138_v25 = vld [vmem:[%s3745_s3 + $0x2c8] sm:$0xff] }
  0x1e   :  { %1987 = vmatprep.subr.mxu1 %v99_v54  ;;  %1945 = vmatprep.subr.mxu0 %v66_v55  ;;  %v39_v22 = vld [vmem:[%s3746_s0 + $0x70] sm:$0xff]  ;;  %v44_v24 = vld [vmem:[%s3746_s0 + $0x98] sm:$0xff]  ;;  %v122_v27 = vld [vmem:[%s3745_s3 + $0x248] sm:$0xff] }
  0x1f   :  { %1988 = vmatpush3.msra.mxu1 %v83_v56  ;;  %1946 = vmatpush3.msra.mxu0 %v50_v57  ;;  %v123_v23 = vld [vmem:[%s3745_s3 + $0x250] sm:$0xff]  ;;  %v46_v28 = vld [vmem:[%s3746_s0 + $0xa8] sm:$0xff]  ;;  %v137_v29 = vld [vmem:[%s3745_s3 + $0x2c0] sm:$0xff] }
  0x20   :  { %1989 = vmatprep.subr.mxu1 %v98_v58  ;;  %1947 = vmatprep.subr.mxu0 %v65_v59  ;;  %v43_v26 = vld [vmem:[%s3746_s0 + $0x90] sm:$0xff]  ;;  %v45_v30 = vld [vmem:[%s3746_s0 + $0xa0] sm:$0xff]  ;;  %v30_v32 = vld [vmem:[%s3746_s0 + $0x28] sm:$0xff] }
  0x21   :  { %216 = vmatprep.mubr.f32.mxu0 %v26_v60  ;;  %1948 = vmatpush3.msra.mxu0 %v49_v61  ;;  %v121_v31 = vld [vmem:[%s3745_s3 + $0x240] sm:$0xff]  ;;  %v136_v33 = vld [vmem:[%s3745_s3 + $0x2b8] sm:$0xff]  ;;  %v135_v35 = vld [vmem:[%s3745_s3 + $0x2b0] sm:$0xff] }
  0x22   :  { %1990 = vmatpush3.msra.mxu1 %v82_v62  ;;  %217 = vmatmul.mubr.f32.vlgmr.msra.gmra.mxu0 %v25_v63  ;;  %v120_v34 = vld [vmem:[%s3745_s3 + $0x238] sm:$0xff]  ;;  %v119_v36 = vld [vmem:[%s3745_s3 + $0x230] sm:$0xff]  ;;  %v134_v37 = vld [vmem:[%s3745_s3 + $0x2a8] sm:$0xff] }
  0x23   :  { %1991 = vmatprep.subr.mxu1 %v97_v0  ;;  %2005 = vmatprep.subr.mxu0 %v144_v1  ;;  %v118_v38 = vld [vmem:[%s3745_s3 + $0x228] sm:$0xff]  ;;  %v133_v39 = vld [vmem:[%s3745_s3 + $0x2a0] sm:$0xff]  ;;  %v132_v41 = vld [vmem:[%s3745_s3 + $0x298] sm:$0xff] }
  0x24   :  { %1992 = vmatpush3.msra.mxu1 %v81_v2  ;;  %301 = vmatprep.mubr.f32.mxu1 %v28_v3  ;;  %v117_v40 = vld [vmem:[%s3745_s3 + $0x220] sm:$0xff]  ;;  %v116_v42 = vld [vmem:[%s3745_s3 + $0x218] sm:$0xff]  ;;  %v131_v43 = vld [vmem:[%s3745_s3 + $0x290] sm:$0xff] }
  0x25   :  { %2006 = vmatpush3.msra.mxu0 %v128_v4  ;;  %302 = vmatmul.mubr.f32.vlgmr.msra.gmra.mxu1 %v27_v5  ;;  %v115_v44 = vld [vmem:[%s3745_s3 + $0x210] sm:$0xff]  ;;  %v130_v45 = vld [vmem:[%s3745_s3 + $0x288] sm:$0xff]  ;;  %v129_v47 = vld [vmem:[%s3745_s3 + $0x280] sm:$0xff]  ;;  %v2422_v4 = vmov 0.0  }
  0x26   :  { %2007 = vmatprep.subr.mxu0 %v143_v6  ;;  %221 = vmatprep.mubr.f32.mxu0 %v32_v8  ;;  %v114_v46 = vld [vmem:[%s3745_s3 + $0x208] sm:$0xff]  ;;  %v113_v48 = vld [vmem:[%s3745_s3 + $0x200] sm:$0xff]  ;;  %v36_v50 = vld [vmem:[%s3746_s0 + $0x58] sm:$0xff] }
  0x27   :  { %2008 = vmatpush3.msra.mxu0 %v127_v7  ;;  %306 = vmatprep.mubr.f32.mxu1 %v34_v12  ;;  %v29_v49 = vld [vmem:[%s3746_s0 + $0x20] sm:$0xff]  ;;  %v35_v51 = vld [vmem:[%s3746_s0 + $0x50] sm:$0xff]  ;;  %v42_v52 = vld [vmem:[%s3746_s0 + $0x88] sm:$0xff] }
  0x28   :  { %2009 = vmatprep.subr.mxu0 %v142_v9  ;;  %222 = vmatmul.mubr.f32.gmra.mxu0 %v31_v10  ;;  %v41_v53 = vld [vmem:[%s3746_s0 + $0x80] sm:$0xff]  ;;  %v48_v54 = vld [vmem:[%s3746_s0 + $0xb8] sm:$0xff]  ;;  %v47_v55 = vld [vmem:[%s3746_s0 + $0xb0] sm:$0xff] }
  0x29   :  { %2010 = vmatpush3.msra.mxu0 %v126_v11  ;;  %307 = vmatmul.mubr.f32.gmra.mxu1 %v33_v14  ;;  %v426_v56 = vld [vmem:[%s3745_s3 + $0x378] sm:$0xff]  ;;  %v425_v57 = vld [vmem:[%s3745_s3 + $0x370] sm:$0xff]  ;;  %v424_v58 = vld [vmem:[%s3745_s3 + $0x368] sm:$0xff] }
  0x2a   :  { %2011 = vmatprep.subr.mxu0 %v141_v13  ;;  %226 = vmatprep.mubr.f32.mxu0 %v38_v16  ;;  %v423_v59 = vld [vmem:[%s3745_s3 + $0x360] sm:$0xff]  ;;  %v422_v60 = vld [vmem:[%s3745_s3 + $0x358] sm:$0xff]  ;;  %v421_v61 = vld [vmem:[%s3745_s3 + $0x350] sm:$0xff] }
  0x2b   :  { %2012 = vmatpush3.msra.mxu0 %v125_v15  ;;  %311 = vmatprep.mubr.f32.mxu1 %v40_v20  ;;  %v420_v62 = vld [vmem:[%s3745_s3 + $0x348] sm:$0xff]  ;;  %v419_v63 = vld [vmem:[%s3745_s3 + $0x340] sm:$0xff]  ;;  %v418_v0 = vld [vmem:[%s3745_s3 + $0x338] sm:$0xff] }
  0x2c   :  { %2013 = vmatprep.subr.mxu0 %v140_v17  ;;  %227 = vmatmul.mubr.f32.gmra.mxu0 %v37_v18  ;;  %v417_v1 = vld [vmem:[%s3745_s3 + $0x330] sm:$0xff]  ;;  %v416_v2 = vld [vmem:[%s3745_s3 + $0x328] sm:$0xff]  ;;  %v2862_v3 = vld [vmem:[%s3745_s3 + $0x398] sm:$0xff] }
  0x2d   :  { %2014 = vmatpush3.msra.mxu0 %v124_v19  ;;  %312 = vmatmul.mubr.f32.gmra.mxu1 %v39_v22  ;;  %v415_v5 = vld [vmem:[%s3745_s3 + $0x320] sm:$0xff]  ;;  %v414_v6 = vld [vmem:[%s3745_s3 + $0x318] sm:$0xff]  ;;  %v413_v7 = vld [vmem:[%s3745_s3 + $0x310] sm:$0xff] }
  0x2e   :  { %2015 = vmatprep.subr.mxu0 %v139_v21  ;;  %231 = vmatprep.mubr.f32.mxu0 %v44_v24  ;;  %v2879_v8 = vld [vmem:[%s3745_s3 + $0x390] sm:$0xff]  ;;  %v412_v9 = vld [vmem:[%s3745_s3 + $0x308] sm:$0xff]  ;;  %v411_v10 = vld [vmem:[%s3745_s3 + $0x300] sm:$0xff] }
  0x2f   :  { %2016 = vmatpush3.msra.mxu0 %v123_v23  ;;  %316 = vmatprep.mubr.f32.mxu1 %v46_v28  ;;  %v2892_v11 = vld [vmem:[%s3745_s3 + $0x388] sm:$0xff]  ;;  %v2899_v12 = vld [vmem:[%s3745_s3 + $0x380] sm:$0xff] }
  0x30   :  { %2017 = vmatprep.subr.mxu0 %v138_v25  ;;  %232 = vmatmul.mubr.f32.gmra.mxu0 %v43_v26  ;;  %v1902_v25 = vld [vmem:[%s3747_s5] ss:$0 sm:$0xff] }
  0x31   :  { %2018 = vmatpush3.msra.mxu0 %v122_v27  ;;  %317 = vmatmul.mubr.f32.gmra.mxu1 %v45_v30 }
  0x32   :  { %2019 = vmatprep.subr.mxu0 %v137_v29  ;;  %386 = vmatprep.mubr.f32.mxu0 %v30_v32 }
  0x33   :  { %2020 = vmatpush3.msra.mxu0 %v121_v31  ;;  %2225 = vmatprep.subr.mxu1 %v426_v56 }
  0x34   :  { %2021 = vmatprep.subr.mxu0 %v136_v33  ;;  %2226 = vmatpush3.msra.mxu1 %v426_v56 }
  0x35   :  { %2022 = vmatpush3.msra.mxu0 %v120_v34  ;;  %2227 = vmatprep.subr.mxu1 %v425_v57 }
  0x36   :  { %2023 = vmatprep.subr.mxu0 %v135_v35  ;;  %2228 = vmatpush3.msra.mxu1 %v425_v57 }
  0x37   :  { %2024 = vmatpush3.msra.mxu0 %v119_v36  ;;  %2229 = vmatprep.subr.mxu1 %v424_v58 }
  0x38   :  { %2025 = vmatprep.subr.mxu0 %v134_v37  ;;  %2230 = vmatpush3.msra.mxu1 %v424_v58 }
  0x39   :  { %2026 = vmatpush3.msra.mxu0 %v118_v38  ;;  %2231 = vmatprep.subr.mxu1 %v423_v59 }
  0x3a   :  { %2027 = vmatprep.subr.mxu0 %v133_v39  ;;  %2232 = vmatpush3.msra.mxu1 %v423_v59 }
  0x3b   :  { %2028 = vmatpush3.msra.mxu0 %v117_v40  ;;  %2233 = vmatprep.subr.mxu1 %v422_v60 }
  0x3c   :  { %2029 = vmatprep.subr.mxu0 %v132_v41  ;;  %2234 = vmatpush3.msra.mxu1 %v422_v60 }
  0x3d   :  { %2030 = vmatpush3.msra.mxu0 %v116_v42  ;;  %2235 = vmatprep.subr.mxu1 %v421_v61 }
  0x3e   :  { %2031 = vmatprep.subr.mxu0 %v131_v43  ;;  %2236 = vmatpush3.msra.mxu1 %v421_v61 }
  0x3f   :  { %2032 = vmatpush3.msra.mxu0 %v115_v44  ;;  %2237 = vmatprep.subr.mxu1 %v420_v62 }
  0x40   :  { %2033 = vmatprep.subr.mxu0 %v130_v45  ;;  %2238 = vmatpush3.msra.mxu1 %v420_v62 }
  0x41   :  { %2034 = vmatpush3.msra.mxu0 %v114_v46  ;;  %2239 = vmatprep.subr.mxu1 %v419_v63 }
  0x42   :  { %2035 = vmatprep.subr.mxu0 %v129_v47  ;;  %2240 = vmatpush3.msra.mxu1 %v419_v63 }
  0x43   :  { %2036 = vmatpush3.msra.mxu0 %v113_v48  ;;  %2241 = vmatprep.subr.mxu1 %v418_v0 }
  0x44   :  { %387 = vmatmul.mubr.f32.vlgmr.msra.gmra.mxu0 %v29_v49  ;;  %2242 = vmatpush3.msra.mxu1 %v418_v0 }
  0x45   :  { %391 = vmatprep.mubr.f32.mxu0 %v36_v50  ;;  %2243 = vmatprep.subr.mxu1 %v417_v1 }
  0x46   :  { %2244 = vmatpush3.msra.mxu1 %v417_v1  ;;  %2263 = vmatprep.subr.mxu0 %v2422_v4 }
  0x47   :  { %2245 = vmatprep.subr.mxu1 %v416_v2  ;;  %2264 = vmatpush3.msra.mxu0 %v2862_v3 }
  0x48   :  { %392 = vmatmul.mubr.f32.gmra.mxu0 %v35_v51  ;;  %2246 = vmatpush3.msra.mxu1 %v416_v2 }
  0x49   :  { %396 = vmatprep.mubr.f32.mxu0 %v42_v52  ;;  %2247 = vmatprep.subr.mxu1 %v415_v5 }
  0x4a   :  { %2265 = vmatprep.subr.mxu0 %v2422_v4  ;;  %2248 = vmatpush3.msra.mxu1 %v415_v5 }
  0x4b   :  { %2249 = vmatprep.subr.mxu1 %v414_v6  ;;  %2266 = vmatpush3.msra.mxu0 %v2879_v8 }
  0x4c   :  { %397 = vmatmul.mubr.f32.gmra.mxu0 %v41_v53  ;;  %2250 = vmatpush3.msra.mxu1 %v414_v6  ;;  %v2933_v6 = vld [vmem:[%s3747_s5 + $0x1] ss:$0 sm:$0xff] }
  0x4d   :  { %401 = vmatprep.mubr.f32.mxu0 %v48_v54  ;;  %2251 = vmatprep.subr.mxu1 %v413_v7 }
  0x4e   :  { %2252 = vmatpush3.msra.mxu1 %v413_v7  ;;  %2267 = vmatprep.subr.mxu0 %v2422_v4 }
  0x4f   :  { %2253 = vmatprep.subr.mxu1 %v412_v9  ;;  %2268 = vmatpush3.msra.mxu0 %v2892_v11 }
  0x50   :  { %402 = vmatmul.mubr.f32.gmra.mxu0 %v47_v55  ;;  %2254 = vmatpush3.msra.mxu1 %v412_v9 }
  0x51   :  { %2255 = vmatprep.subr.mxu1 %v411_v10  ;;  %2269 = vmatprep.subr.mxu0 %v2422_v4 }
  0x52   :  { %2256 = vmatpush3.msra.mxu1 %v411_v10  ;;  %2270 = vmatpush3.msra.mxu0 %v2899_v12 }
  0x53   :  { %2285 = vmatprep.subr.mxu1 %v2422_v4  ;;  %2271 = vmatprep.mubr.msk.f32.mxu0 %vm2423_vm0, %v2422_v4 }
  0x54   :  { %2272 = vmatmul.mubr.f32.vlgmr.msra.gmra.mxu0 %v2422_v4  ;;  %2274 = vmatprep.subr.mxu0 %v2422_v4 }
  0x55   :  { %2275 = vmatpush3.msra.mxu0 %v2862_v3  ;;  %2282 = vmatprep.mubr.msk.f32.mxu0 %vm2423_vm0, %v2422_v4 }
  0x56   :  { %2276 = vmatprep.subr.mxu0 %v2422_v4 }
  0x57   :  { %2277 = vmatpush3.msra.mxu0 %v2879_v8 }
  0x58   :  { %2278 = vmatprep.subr.mxu0 %v2422_v4 }
  0x59   :  { %2279 = vmatpush3.msra.mxu0 %v2892_v11 }
  0x5a   :  { %2280 = vmatprep.subr.mxu0 %v2422_v4 }
  0x5b   :  { %2281 = vmatpush3.msra.mxu0 %v2899_v12 }
  0x5c   :  { %2296 = vmatprep.subr.mxu0 %v2422_v4 }
  0xe2   :  { %v1949_v13 = vpop.f32.mrf.mxu0 }
  0xe4   :  { %v1950_v14 = vpop.f32.mrf.mxu0 }
  0xe5   :  { %v1993_v16 = vpop.f32.mrf.mxu1  ;;  %v1951_v24 = vadd.f32 %v1950_v14, %v1949_v13 }
  0xe7   :  { %v1994_v18 = vpop.f32.mrf.mxu1  ;;  %v219_v28 = vadd.f32 %v1951_v24, %v1902_v25 }
  0xe8   :  { %v1952_v15 = vpop.f32.mrf.mxu0  ;;  %v1995_v29 = vadd.f32 %v1994_v18, %v1993_v16 }
  0xe9   :  { %v1996_v20 = vpop.f32.mrf.mxu1 }
  0xea   :  { %v1953_v17 = vpop.f32.mrf.mxu0  ;;  %v304_v35 = vadd.f32 %v1995_v29, %v219_v28 }
  0xeb   :  { %v1997_v22 = vpop.f32.mrf.mxu1  ;;  %v1954_v30 = vadd.f32 %v1953_v17, %v1952_v15 }
  0xec   :  { %v1955_v19 = vpop.f32.mrf.mxu0  ;;  %v1998_v37 = vadd.f32 %v1997_v22, %v1996_v20 }
  0xed   :  { %v1999_v26 = vpop.f32.mrf.mxu1  ;;  %v224_v36 = vadd.f32 %v1954_v30, %v1902_v25 }
  0xee   :  { %v1956_v21 = vpop.f32.mrf.mxu0 }
  0xef   :  { %v2000_v31 = vpop.f32.mrf.mxu1  ;;  %v1957_v33 = vadd.f32 %v1956_v21, %v1955_v19  ;;  %v309_v45 = vadd.f32 %v1998_v37, %v224_v36 }
  0xf0   :  { %v1958_v23 = vpop.f32.mrf.mxu0  ;;  %v2001_v43 = vadd.f32 %v2000_v31, %v1999_v26 }
  0xf1   :  { %v2002_v39 = vpop.f32.mrf.mxu1  ;;  %v229_v42 = vadd.f32 %v1957_v33, %v1902_v25 }
  0xf2   :  { %v1959_v27 = vpop.f32.mrf.mxu0 }
  0xf3   :  { %v1960_v46 = vadd.f32 %v1959_v27, %v1958_v23  ;;  %v2003_v49 = vpop.f32.mrf.mxu1  ;;  %v314_v52 = vadd.f32 %v2001_v43, %v229_v42 }
  0xf4   :  { %v2004_v55 = vadd.f32 %v2003_v49, %v2002_v39 }
  0xf5   :  { %v234_v54 = vadd.f32 %v1960_v46, %v1902_v25 }
  0xf7   :  { %v319_v61 = vadd.f32 %v2004_v55, %v234_v54 }
 0x104   :  { %v2037_v32 = vpop.f32.mrf.mxu0 }
 0x106   :  { %v2038_v34 = vpop.f32.mrf.mxu0 }
 0x107   :  { %v2039_v38 = vadd.f32 %v2038_v34, %v2037_v32 }
 0x108   :  { %v2040_v40 = vpop.f32.mrf.mxu0 }
 0x109   :  { %v389_v41 = vadd.f32 %v2039_v38, %v304_v35 }
 0x10a   :  { %v2041_v44 = vpop.f32.mrf.mxu0 }
 0x10b   :  { %v407_v47 = vmax.f32 %v389_v41, 0.0  ;;  %v2042_v48 = vadd.f32 %v2041_v44, %v2040_v40 }
 0x10c   :  { %v2043_v50 = vpop.f32.mrf.mxu0 }
 0x10d   :  { %v394_v51 = vadd.f32 %v2042_v48, %v309_v45  ;;  %2257 = vmatprep.mubr.f32.mxu1 %v407_v47 }
 0x10e   :  { %v2044_v53 = vpop.f32.mrf.mxu0 }
 0x10f   :  { %v408_v56 = vmax.f32 %v394_v51, 0.0  ;;  %v2045_v57 = vadd.f32 %v2044_v53, %v2043_v50 }
 0x110   :  { %v2046_v58 = vpop.f32.mrf.mxu0 }
 0x111   :  { %v399_v59 = vadd.f32 %v2045_v57, %v314_v52  ;;  %2258 = vmatmul.mubr.f32.vlgmr.msra.gmra.mxu1 %v408_v56 }
 0x112   :  { %v2047_v60 = vpop.f32.mrf.mxu0  ;;  %2286 = vmatpush3.msra.mxu1 %v2862_v3 }
 0x113   :  { %v409_v62 = vmax.f32 %v399_v59, 0.0  ;;  %v2048_v63 = vadd.f32 %v2047_v60, %v2046_v58  ;;  %2287 = vmatprep.subr.mxu1 %v2422_v4 }
 0x114   :  { %2288 = vmatpush3.msra.mxu1 %v2879_v8  ;;  %v593_v2 = vpop.f32.mrf.mxu0 }
 0x115   :  { %v404_v0 = vadd.f32 %v2048_v63, %v319_v61  ;;  %2260 = vmatprep.mubr.f32.mxu1 %v409_v62  ;;  %2289 = vmatprep.subr.mxu1 %v2422_v4 }
 0x116   :  { %2290 = vmatpush3.msra.mxu1 %v2892_v11  ;;  %v2273_v5 = vpop.f32.mrf.mxu0 }
 0x117   :  { %v410_v1 = vmax.f32 %v404_v0, 0.0  ;;  %2291 = vmatprep.subr.mxu1 %v2422_v4 }
 0x118   :  { %2292 = vmatpush3.msra.mxu1 %v2899_v12 }
 0x119   :  { %2261 = vmatmul.mubr.f32.gmra.mxu1 %v410_v1  ;;  %2307 = vmatprep.subr.mxu1 %v2422_v4 }
 0x11a   :  { %2293 = vmatprep.mubr.msk.f32.mxu1 %vm2423_vm0, %v2422_v4 }
 0x1d1   :  { %v2259_v7 = vpop.f32.mrf.mxu1 }
 0x1d2   :  { %v506_v9 = vadd.f32 %v2259_v7, %v2933_v6 }
 0x1d3   :  { %v500_v10 = vpop.f32.mrf.mxu1 }
 0x1d4   :  { %v501_v13 = vadd.f32 %v2933_v6, %v500_v10 }
 0x1d6   :  { %v597_v14 = vadd.f32 %v593_v2, %v501_v13 }
 0x1d8   :  { %2376 = vtanh.f32 %v597_v14  ;;  %v1904_v18 = vmul.f32 -1.442695, %v597_v14 }
 0x1d9   :  { %v2262_v15 = vpop.f32.mrf.mxu1 }
 0x1da   :  { %v2938_v16 = vadd.f32 %v2262_v15, %v2933_v6  ;;  %2378 = vpow2.f32 %v1904_v18  ;;  %v924_v18 = vld [vmem:[%s3745_s3 + $0x3b0] sm:$0xff] }
 0x1db   :  { %v510_v44 = vpop.f32.mrf.mxu1 }
 0x1dc   :  { %v511_v45 = vadd.f32 %v2933_v6, %v510_v44  ;;  %v1185_v44 = vld [vmem:[%s3749_s4 + $0x2a8] sm:$0xff] }
 0x1e5   :  { %v2377_v17 = vpop.eup %2376 }
 0x1e6   :  { %607 = vrot.lane.b32.xlu0 %v2377_v17, %s2424_s30 }
 0x1e7   :  { %v2379_v19 = vpop.eup %2378 }
 0x1e8   :  { %v601_v20 = vadd.f32 1.0, %v2379_v19  ;;  %v923_v19 = vld [vmem:[%s3745_s3 + $0x3a8] sm:$0xff] }
 0x1ea   :  { %2380 = vrcp.f32 %v601_v20  ;;  %v922_v20 = vld [vmem:[%s3745_s3 + $0x3a0] sm:$0xff] }
 0x1f7   :  { %v2381_v21 = vpop.eup %2380 }
 0x1f8   :  { %v605_v24 = vmul.f32 0.0, %v2381_v21 }
 0x258   :  { %v608_v22 = vpop.permute.xlu0 %607 }
 0x259   :  { %v610_v23 = vmul.f32 %v2381_v21, %v608_v22  ;;  %v1011_v22 = vld [vmem:[%s3748_s2] sm:$0xff] }
 0x25b   :  { %612 = vrot.lane.b32.xlu0 %v610_v23, %s2425_s8 }
 0x2cd   :  { %v613_v25 = vpop.permute.xlu0 %612 }
 0x2ce   :  { %v615_v26 = vadd.f32 %v613_v25, %v605_v24 }
 0x2d0   :  { %2382 = vtanh.f32 %v615_v26 }
 0x2dd   :  { %v2383_v27 = vpop.eup %2382 }
 0x2de   :  { %618 = vrot.lane.b32.xlu1 %v2383_v27, %s2424_s30  ;;  %v1028_v27 = vld [vmem:[%s3745_s3 + $0x3f0] sm:$0xff] }
 0x350   :  { %v619_v28 = vpop.permute.xlu1 %618 }
 0x351   :  { %v621_v29 = vmul.f32 %v2381_v21, %v619_v28  ;;  %v1027_v28 = vld [vmem:[%s3745_s3 + $0x3e8] sm:$0xff] }
 0x353   :  { %623 = vrot.lane.b32.xlu1 %v621_v29, %s2425_s8  ;;  %v1026_v29 = vld [vmem:[%s3745_s3 + $0x3e0] sm:$0xff] }
 0x3c5   :  { %v624_v30 = vpop.permute.xlu1 %623 }
 0x3c6   :  { %2283 = vmatmul.mubr.msk.f32.vlgmr.msra.gmra.mxu0 %vm523_vm1, %v624_v30  ;;  %v1025_v30 = vld [vmem:[%s3745_s3 + $0x3d8] sm:$0xff] }
 0x3c7   :  { %2297 = vmatpush3.msra.mxu0 %v2862_v3  ;;  %2304 = vmatprep.mubr.msk.f32.mxu0 %vm2423_vm0, %v2422_v4 }
 0x3c8   :  { %2298 = vmatprep.subr.mxu0 %v2422_v4 }
 0x3c9   :  { %2299 = vmatpush3.msra.mxu0 %v2879_v8 }
 0x3ca   :  { %2300 = vmatprep.subr.mxu0 %v2422_v4 }
 0x3cb   :  { %2301 = vmatpush3.msra.mxu0 %v2892_v11 }
 0x3cc   :  { %2302 = vmatprep.subr.mxu0 %v2422_v4 }
 0x3cd   :  { %2303 = vmatpush3.msra.mxu0 %v2899_v12 }
 0x3ce   :  { %2318 = vmatprep.subr.mxu0 %v2422_v4 }
 0x486   :  { %v693_v31 = vpop.f32.mrf.mxu0 }
 0x487   :  { %v697_v32 = vadd.f32 %v693_v31, %v506_v9  ;;  %v1024_v31 = vld [vmem:[%s3745_s3 + $0x3d0] sm:$0xff] }
 0x488   :  { %v2284_v3 = vpop.f32.mrf.mxu0 }
 0x489   :  { %2384 = vtanh.f32 %v697_v32  ;;  %v1906_v34 = vmul.f32 -1.442695, %v697_v32  ;;  %v1911_v32 = vld [vmem:[%s3747_s5 + $0x2] ss:$0 sm:$0xff]  ;;  %v1023_v3 = vld [vmem:[%s3745_s3 + $0x3c8] sm:$0xff] }
 0x48b   :  { %2386 = vpow2.f32 %v1906_v34 }
 0x496   :  { %v2385_v33 = vpop.eup %2384 }
 0x497   :  { %707 = vrot.lane.b32.xlu0 %v2385_v33, %s2424_s30 }
 0x498   :  { %v2387_v8 = vpop.eup %2386 }
 0x499   :  { %v701_v35 = vadd.f32 1.0, %v2387_v8 }
 0x49b   :  { %2388 = vrcp.f32 %v701_v35 }
 0x4a8   :  { %v2389_v36 = vpop.eup %2388 }
 0x4a9   :  { %v705_v12 = vmul.f32 %v2389_v36, %v615_v26  ;;  %v1029_v26 = vld [vmem:[%s3745_s3 + $0x3f8] sm:$0xff] }
 0x509   :  { %v708_v11 = vpop.permute.xlu0 %707 }
 0x50a   :  { %v710_v37 = vmul.f32 %v2389_v36, %v708_v11  ;;  %v1022_v11 = vld [vmem:[%s3745_s3 + $0x3c0] sm:$0xff] }
 0x50c   :  { %712 = vrot.lane.b32.xlu1 %v710_v37, %s2425_s8  ;;  %v1203_v37 = vld [vmem:[%s3749_s4 + $0x350] sm:$0xff] }
 0x57e   :  { %v713_v38 = vpop.permute.xlu1 %712 }
 0x57f   :  { %v715_v39 = vadd.f32 %v713_v38, %v705_v12  ;;  %v1205_v12 = vld [vmem:[%s3749_s4 + $0x360] sm:$0xff]  ;;  %v1202_v38 = vld [vmem:[%s3749_s4 + $0x348] sm:$0xff] }
 0x581   :  { %2390 = vtanh.f32 %v715_v39 }
 0x58e   :  { %v2391_v40 = vpop.eup %2390 }
 0x58f   :  { %718 = vrot.lane.b32.xlu0 %v2391_v40, %s2424_s30  ;;  %v1196_v40 = vld [vmem:[%s3749_s4 + $0x310] sm:$0xff] }
 0x601   :  { %v719_v41 = vpop.permute.xlu0 %718 }
 0x602   :  { %v721_v42 = vmul.f32 %v2389_v36, %v719_v41  ;;  %v1191_v41 = vld [vmem:[%s3749_s4 + $0x2e0] sm:$0xff] }
 0x604   :  { %723 = vrot.lane.b32.xlu1 %v721_v42, %s2425_s8  ;;  %v1190_v42 = vld [vmem:[%s3749_s4 + $0x2d8] sm:$0xff] }
 0x676   :  { %v724_v43 = vpop.permute.xlu1 %723 }
 0x677   :  { %2294 = vmatmul.mubr.msk.f32.vlgmr.msra.gmra.mxu1 %vm523_vm1, %v724_v43 }
 0x678   :  { %2315 = vmatprep.mubr.msk.f32.mxu1 %vm2423_vm0, %v2422_v4 }
 0x737   :  { %v793_v46 = vpop.f32.mrf.mxu1 }
 0x738   :  { %v797_v47 = vadd.f32 %v793_v46, %v511_v45  ;;  %v1184_v45 = vld [vmem:[%s3749_s4 + $0x2a0] sm:$0xff] }
 0x739   :  { %v2295_v48 = vpop.f32.mrf.mxu1 }
 0x73a   :  { %2392 = vtanh.f32 %v797_v47  ;;  %v1908_v50 = vmul.f32 -1.442695, %v797_v47  ;;  %v1179_v47 = vld [vmem:[%s3749_s4 + $0x270] sm:$0xff] }
 0x73c   :  { %2394 = vpow2.f32 %v1908_v50  ;;  %v1173_v50 = vld [vmem:[%s3749_s4 + $0x238] sm:$0xff] }
 0x747   :  { %v2393_v49 = vpop.eup %2392 }
 0x748   :  { %807 = vrot.lane.b32.xlu0 %v2393_v49, %s2424_s30  ;;  %v1178_v49 = vld [vmem:[%s3749_s4 + $0x268] sm:$0xff] }
 0x749   :  { %v2395_v51 = vpop.eup %2394 }
 0x74a   :  { %v801_v52 = vadd.f32 1.0, %v2395_v51  ;;  %v1172_v51 = vld [vmem:[%s3749_s4 + $0x230] sm:$0xff] }
 0x74c   :  { %2396 = vrcp.f32 %v801_v52  ;;  %v1167_v52 = vld [vmem:[%s3749_s4 + $0x200] sm:$0xff] }
 0x759   :  { %v2397_v53 = vpop.eup %2396 }
 0x75a   :  { %v805_v56 = vmul.f32 %v2397_v53, %v715_v39  ;;  %v1197_v39 = vld [vmem:[%s3749_s4 + $0x318] sm:$0xff] }
 0x7ba   :  { %v808_v54 = vpop.permute.xlu0 %807 }
 0x7bb   :  { %v810_v55 = vmul.f32 %v2397_v53, %v808_v54  ;;  %v1161_v54 = vld [vmem:[%s3749_s4 + $0x1c8] sm:$0xff] }
 0x7bd   :  { %812 = vrot.lane.b32.xlu1 %v810_v55, %s2425_s8  ;;  %v1160_v55 = vld [vmem:[%s3749_s4 + $0x1c0] sm:$0xff] }
 0x82f   :  { %v813_v57 = vpop.permute.xlu1 %812 }
 0x830   :  { %v815_v58 = vadd.f32 %v813_v57, %v805_v56  ;;  %v1155_v56 = vld [vmem:[%s3749_s4 + $0x190] sm:$0xff]  ;;  %v1154_v57 = vld [vmem:[%s3749_s4 + $0x188] sm:$0xff] }
 0x832   :  { %2398 = vtanh.f32 %v815_v58 }
 0x83f   :  { %v2399_v59 = vpop.eup %2398 }
 0x840   :  { %818 = vrot.lane.b32.xlu0 %v2399_v59, %s2424_s30  ;;  %v1148_v59 = vld [vmem:[%s3749_s4 + $0x150] sm:$0xff] }
 0x8b2   :  { %v819_v60 = vpop.permute.xlu0 %818 }
 0x8b3   :  { %v821_v61 = vmul.f32 %v2397_v53, %v819_v60  ;;  %v1166_v53 = vld [vmem:[%s3749_s4 + $0x1f8] sm:$0xff]  ;;  %v1143_v60 = vld [vmem:[%s3749_s4 + $0x120] sm:$0xff] }
 0x8b5   :  { %823 = vrot.lane.b32.xlu1 %v821_v61, %s2425_s8  ;;  %v1142_v61 = vld [vmem:[%s3749_s4 + $0x118] sm:$0xff] }
 0x927   :  { %v824_v62 = vpop.permute.xlu1 %823 }
 0x928   :  { %2305 = vmatmul.mubr.msk.f32.vlgmr.msra.gmra.mxu0 %vm523_vm1, %v824_v62  ;;  %v1137_v62 = vld [vmem:[%s3749_s4 + $0xe8] sm:$0xff] }
 0x929   :  { %2334 = vmatprep.mubr.msk.f32.mxu0 %vm2423_vm0, %v2422_v4  ;;  %2319 = vmatpush3.msra.mxu0 %v1029_v26  ;;  %v1163_v26 = vld [vmem:[%s3749_s4 + $0x1d8] sm:$0xff] }
 0x92a   :  { %2320 = vmatprep.subr.mxu0 %v2422_v4 }
 0x92b   :  { %2321 = vmatpush3.msra.mxu0 %v1028_v27  ;;  %v1162_v27 = vld [vmem:[%s3749_s4 + $0x1d0] sm:$0xff] }
 0x92c   :  { %2322 = vmatprep.subr.mxu0 %v2422_v4 }
 0x92d   :  { %2323 = vmatpush3.msra.mxu0 %v1027_v28  ;;  %v1157_v28 = vld [vmem:[%s3749_s4 + $0x1a0] sm:$0xff] }
 0x92e   :  { %2324 = vmatprep.subr.mxu0 %v2422_v4 }
 0x92f   :  { %2325 = vmatpush3.msra.mxu0 %v1026_v29  ;;  %v1156_v29 = vld [vmem:[%s3749_s4 + $0x198] sm:$0xff] }
 0x930   :  { %2326 = vmatprep.subr.mxu0 %v2422_v4 }
 0x931   :  { %2327 = vmatpush3.msra.mxu0 %v1025_v30  ;;  %v1151_v30 = vld [vmem:[%s3749_s4 + $0x168] sm:$0xff] }
 0x932   :  { %2328 = vmatprep.subr.mxu0 %v2422_v4 }
 0x933   :  { %2329 = vmatpush3.msra.mxu0 %v1024_v31  ;;  %v1150_v31 = vld [vmem:[%s3749_s4 + $0x160] sm:$0xff] }
 0x934   :  { %2330 = vmatprep.subr.mxu0 %v2422_v4 }
 0x935   :  { %2331 = vmatpush3.msra.mxu0 %v1023_v3  ;;  %v1144_v3 = vld [vmem:[%s3749_s4 + $0x128] sm:$0xff] }
 0x936   :  { %2332 = vmatprep.subr.mxu0 %v2422_v4 }
 0x937   :  { %2333 = vmatpush3.msra.mxu0 %v1022_v11  ;;  %v1126_v11 = vld [vmem:[%s3749_s4 + $0x80] sm:$0xff] }
 0x938   :  { %1311 = vmatprep.subr.mxu0 %v1205_v12  ;;  %v1121_v12 = vld [vmem:[%s3749_s4 + $0x50] sm:$0xff] }
 0x9e8   :  { %v893_v63 = vpop.f32.mrf.mxu0 }
 0x9e9   :  { %v897_v0 = vadd.f32 %v893_v63, %v2938_v16  ;;  %v925_v16 = vld [vmem:[%s3745_s3 + $0x3b8] sm:$0xff]  ;;  %v1136_v63 = vld [vmem:[%s3749_s4 + $0xe0] sm:$0xff] }
 0x9ea   :  { %v2306_v1 = vpop.f32.mrf.mxu0  ;;  %2308 = vmatpush3.msra.mxu1 %v925_v16  ;;  %v1192_v16 = vld [vmem:[%s3749_s4 + $0x2e8] sm:$0xff] }
 0x9eb   :  { %2400 = vtanh.f32 %v897_v0  ;;  %v1910_v5 = vmul.f32 -1.442695, %v897_v0  ;;  %2309 = vmatprep.subr.mxu1 %v2422_v4  ;;  %v1131_v0 = vld [vmem:[%s3749_s4 + $0xb0] sm:$0xff]  ;;  %v1130_v1 = vld [vmem:[%s3749_s4 + $0xa8] sm:$0xff] }
 0x9ec   :  { %2310 = vmatpush3.msra.mxu1 %v924_v18  ;;  %v1187_v18 = vld [vmem:[%s3749_s4 + $0x2b8] sm:$0xff] }
 0x9ed   :  { %2402 = vpow2.f32 %v1910_v5  ;;  %2311 = vmatprep.subr.mxu1 %v2422_v4  ;;  %v1124_v5 = vld [vmem:[%s3749_s4 + $0x70] sm:$0xff] }
 0x9ee   :  { %2312 = vmatpush3.msra.mxu1 %v923_v19  ;;  %v1186_v19 = vld [vmem:[%s3749_s4 + $0x2b0] sm:$0xff] }
 0x9ef   :  { %2313 = vmatprep.subr.mxu1 %v2422_v4 }
 0x9f0   :  { %2314 = vmatpush3.msra.mxu1 %v922_v20  ;;  %v1181_v20 = vld [vmem:[%s3749_s4 + $0x280] sm:$0xff] }
 0x9f1   :  { %1240 = vmatprep.subr.mxu1 %v1203_v37  ;;  %v1119_v37 = vld [vmem:[%s3749_s4 + $0x40] sm:$0xff] }
 0x9f8   :  { %v2401_v2 = vpop.eup %2400 }
 0x9f9   :  { %907 = vrot.lane.b32.xlu0 %v2401_v2, %s2424_s30  ;;  %v1125_v2 = vld [vmem:[%s3749_s4 + $0x78] sm:$0xff] }
 0x9fa   :  { %v2403_v6 = vpop.eup %2402 }
 0x9fb   :  { %v901_v7 = vadd.f32 1.0, %v2403_v6 }
 0x9fd   :  { %2404 = vrcp.f32 %v901_v7 }
 0xa0a   :  { %v2405_v9 = vpop.eup %2404 }
 0xa0b   :  { %v905_v14 = vmul.f32 %v2405_v9, %v815_v58  ;;  %v1149_v58 = vld [vmem:[%s3749_s4 + $0x158] sm:$0xff] }
 0xa6b   :  { %v908_v10 = vpop.permute.xlu0 %907 }
 0xa6c   :  { %v910_v13 = vmul.f32 %v2405_v9, %v908_v10 }
 0xa6e   :  { %912 = vrot.lane.b32.xlu1 %v910_v13, %s2425_s8  ;;  %v1199_v13 = vld [vmem:[%s3749_s4 + $0x328] sm:$0xff] }
 0xae0   :  { %v913_v15 = vpop.permute.xlu1 %912 }
 0xae1   :  { %v915_v17 = vadd.f32 %v913_v15, %v905_v14  ;;  %v1198_v15 = vld [vmem:[%s3749_s4 + $0x320] sm:$0xff] }
 0xae3   :  { %2406 = vtanh.f32 %v915_v17  ;;  %v1193_v17 = vld [vmem:[%s3749_s4 + $0x2f0] sm:$0xff] }
 0xaf0   :  { %v2407_v21 = vpop.eup %2406 }
 0xaf1   :  { %918 = vrot.lane.b32.xlu0 %v2407_v21, %s2424_s30  ;;  %v1180_v21 = vld [vmem:[%s3749_s4 + $0x278] sm:$0xff] }
 0xaf5   :  { %1013 = vrot.lane.b32.xlu0 %v1011_v22, %s2424_s30  ;;  %v1175_v22 = vld [vmem:[%s3749_s4 + $0x248] sm:$0xff] }
 0xb63   :  { %v919_v23 = vpop.permute.xlu0 %918 }
 0xb64   :  { %v921_v24 = vmul.f32 %v2405_v9, %v919_v23  ;;  %v1204_v9 = vld [vmem:[%s3749_s4 + $0x358] sm:$0xff]  ;;  %v1174_v23 = vld [vmem:[%s3749_s4 + $0x240] sm:$0xff] }
 0xb66   :  { %934 = vrot.lane.b32.xlu1 %v921_v24, %s2425_s8  ;;  %v1169_v24 = vld [vmem:[%s3749_s4 + $0x210] sm:$0xff] }
 0xb67   :  { %v1014_v43 = vpop.permute.xlu0 %1013 }
 0xbd8   :  { %v935_v25 = vpop.permute.xlu1 %934 }
 0xbd9   :  { %2316 = vmatmul.mubr.msk.f32.vlgmr.msra.gmra.mxu1 %vm523_vm1, %v935_v25  ;;  %v1168_v25 = vld [vmem:[%s3749_s4 + $0x208] sm:$0xff] }
 0xbda   :  { %1304 = vmatprep.mubr.f32.mxu1 %v2422_v4  ;;  %1241 = vmatpush1.msra.mxu1 %v1202_v38  ;;  %v1118_v38 = vld [vmem:[%s3749_s4 + $0x38] sm:$0xff] }
 0xbdb   :  { %1242 = vmatprep.subr.mxu1 %v1197_v39  ;;  %v1120_v39 = vld [vmem:[%s3749_s4 + $0x48] sm:$0xff] }
 0xbdc   :  { %1243 = vmatpush1.msra.mxu1 %v1196_v40  ;;  %v1113_v40 = vld [vmem:[%s3749_s4 + $0x8] sm:$0xff] }
 0xbdd   :  { %1244 = vmatprep.subr.mxu1 %v1191_v41  ;;  %v1115_v41 = vld [vmem:[%s3749_s4 + $0x18] sm:$0xff] }
 0xbde   :  { %1245 = vmatpush1.msra.mxu1 %v1190_v42  ;;  %v1112_v42 = vld [vmem:[%s3749_s4] sm:$0xff] }
 0xbdf   :  { %1246 = vmatprep.subr.mxu1 %v1185_v44  ;;  %v1207_v44 = vld [vmem:[%s3749_s4 + $0x370] sm:$0xff] }
 0xbe0   :  { %1247 = vmatpush1.msra.mxu1 %v1184_v45  ;;  %v1496_v45 = vld [vmem:[%s3745_s3 + $0x4f8] sm:$0xff] }
 0xbe1   :  { %1248 = vmatprep.subr.mxu1 %v1179_v47 }
 0xbe2   :  { %1249 = vmatpush1.msra.mxu1 %v1178_v49 }
 0xbe3   :  { %1250 = vmatprep.subr.mxu1 %v1173_v50 }
 0xbe4   :  { %1251 = vmatpush1.msra.mxu1 %v1172_v51  ;;  %v1206_v51 = vld [vmem:[%s3749_s4 + $0x368] sm:$0xff] }
 0xbe5   :  { %1252 = vmatprep.subr.mxu1 %v1167_v52  ;;  %v1480_v52 = vld [vmem:[%s3745_s3 + $0x478] sm:$0xff] }
 0xbe6   :  { %1253 = vmatpush1.msra.mxu1 %v1166_v53  ;;  %v1201_v53 = vld [vmem:[%s3749_s4 + $0x338] sm:$0xff] }
 0xbe7   :  { %1254 = vmatprep.subr.mxu1 %v1161_v54  ;;  %v1495_v54 = vld [vmem:[%s3745_s3 + $0x4f0] sm:$0xff] }
 0xbe8   :  { %1255 = vmatpush1.msra.mxu1 %v1160_v55  ;;  %v1200_v55 = vld [vmem:[%s3749_s4 + $0x330] sm:$0xff] }
 0xbe9   :  { %1256 = vmatprep.subr.mxu1 %v1155_v56  ;;  %v1479_v56 = vld [vmem:[%s3745_s3 + $0x470] sm:$0xff] }
 0xbea   :  { %1257 = vmatpush1.msra.mxu1 %v1154_v57  ;;  %v1195_v57 = vld [vmem:[%s3749_s4 + $0x300] sm:$0xff] }
 0xbeb   :  { %1258 = vmatprep.subr.mxu1 %v1149_v58  ;;  %v1494_v58 = vld [vmem:[%s3745_s3 + $0x4e8] sm:$0xff] }
 0xbec   :  { %1259 = vmatpush1.msra.mxu1 %v1148_v59  ;;  %v1194_v59 = vld [vmem:[%s3749_s4 + $0x2f8] sm:$0xff] }
 0xbed   :  { %1260 = vmatprep.subr.mxu1 %v1143_v60  ;;  %v1478_v60 = vld [vmem:[%s3745_s3 + $0x468] sm:$0xff] }
 0xbee   :  { %1261 = vmatpush1.msra.mxu1 %v1142_v61  ;;  %v1189_v61 = vld [vmem:[%s3749_s4 + $0x2c8] sm:$0xff] }
 0xbef   :  { %1262 = vmatprep.subr.mxu1 %v1137_v62  ;;  %v1493_v62 = vld [vmem:[%s3745_s3 + $0x4e0] sm:$0xff] }
 0xbf0   :  { %1263 = vmatpush1.msra.mxu1 %v1136_v63  ;;  %v1188_v63 = vld [vmem:[%s3749_s4 + $0x2c0] sm:$0xff] }
 0xbf1   :  { %1264 = vmatprep.subr.mxu1 %v1131_v0  ;;  %v1477_v0 = vld [vmem:[%s3745_s3 + $0x460] sm:$0xff] }
 0xbf2   :  { %1265 = vmatpush1.msra.mxu1 %v1130_v1  ;;  %v1183_v1 = vld [vmem:[%s3749_s4 + $0x290] sm:$0xff] }
 0xbf3   :  { %1266 = vmatprep.subr.mxu1 %v1125_v2  ;;  %v1492_v2 = vld [vmem:[%s3745_s3 + $0x4d8] sm:$0xff] }
 0xbf4   :  { %1267 = vmatpush1.msra.mxu1 %v1124_v5  ;;  %v1182_v5 = vld [vmem:[%s3749_s4 + $0x288] sm:$0xff] }
 0xbf5   :  { %1268 = vmatprep.subr.mxu1 %v1119_v37  ;;  %v1134_v37 = vld [vmem:[%s3749_s4 + $0xc8] sm:$0xff] }
 0xbf6   :  { %1269 = vmatpush1.msra.mxu1 %v1118_v38  ;;  %v1129_v38 = vld [vmem:[%s3749_s4 + $0x98] sm:$0xff] }
 0xbf7   :  { %1270 = vmatprep.subr.mxu1 %v1113_v40  ;;  %v1128_v40 = vld [vmem:[%s3749_s4 + $0x90] sm:$0xff] }
 0xbf8   :  { %1271 = vmatpush1.msra.mxu1 %v1112_v42  ;;  %v1123_v42 = vld [vmem:[%s3749_s4 + $0x60] sm:$0xff] }
 0xbf9   :  { %1382 = vmatprep.subr.mxu1 %v1207_v44  ;;  %v1122_v44 = vld [vmem:[%s3749_s4 + $0x58] sm:$0xff] }
 0xc99   :  { %v1004_v33 = vpop.f32.mrf.mxu1 }
 0xc9a   :  { %v3025_v34 = vadd.f32 %v1911_v32, %v1004_v33  ;;  %v1145_v32 = vld [vmem:[%s3749_s4 + $0x130] sm:$0xff]  ;;  %v1139_v33 = vld [vmem:[%s3749_s4 + $0xf8] sm:$0xff] }
 0xc9b   :  { %v2317_v8 = vpop.f32.mrf.mxu1 }
 0xc9c   :  { %v1008_v35 = vmul.f32 0.5, %v3025_v34  ;;  %1879 = vrot.lane.b32.xlu0 %v3025_v34, %s2424_s30  ;;  %v1133_v8 = vld [vmem:[%s3749_s4 + $0xc0] sm:$0xff] }
 0xc9e   :  { %v1009_v36 = vmul.f32 1.442695, %v1008_v35  ;;  %v1132_v35 = vld [vmem:[%s3749_s4 + $0xb8] sm:$0xff] }
 0xca0   :  { %2408 = vpow2.f32 %v1009_v36  ;;  %v1127_v36 = vld [vmem:[%s3749_s4 + $0x88] sm:$0xff] }
 0xcad   :  { %v2409_v46 = vpop.eup %2408 }
 0xcae   :  { %v1016_v48 = vmul.f32 %v2409_v46, %v1014_v43  ;;  %v1114_v43 = vld [vmem:[%s3749_s4 + $0x10] sm:$0xff] }
 0xcb0   :  { %1018 = vrot.lane.b32.xlu1 %v1016_v48, %s2424_s30 }
 0xcb4   :  { %1883 = vrot.lane.b32.xlu1 %v2409_v46, %s2424_s30  ;;  %v1913_v46 = vld [vmem:[%s3747_s5 + $0x3] ss:$0 sm:$0xff] }
 0xd0e   :  { %v1880_v10 = vpop.permute.xlu0 %1879 }
 0xd22   :  { %v1019_v6 = vpop.permute.xlu1 %1018 }
 0xd23   :  { %v1021_v7 = vadd.f32 %v1019_v6, %v3025_v34  ;;  %v1138_v34 = vld [vmem:[%s3749_s4 + $0xf0] sm:$0xff]  ;;  %v1476_v6 = vld [vmem:[%s3745_s3 + $0x458] sm:$0xff] }
 0xd25   :  { %v1890_v14 = vsel %vm1037_vm2, %v1021_v7, %v1880_v10  ;;  %2335 = vmatmul.mubr.msk.f32.vlgmr.msra.gmra.mxu0 %vm1037_vm2, %v1021_v7  ;;  %v1177_v7 = vld [vmem:[%s3749_s4 + $0x258] sm:$0xff]  ;;  %v1176_v10 = vld [vmem:[%s3749_s4 + $0x250] sm:$0xff] }
 0xd26   :  { %1312 = vmatpush1.msra.mxu0 %v1204_v9  ;;  %1375 = vmatprep.mubr.f32.mxu0 %v2422_v4  ;;  %1892 = vst [vmem:[%s3750_s7] sm:$0xff] %v1890_v14  ;;  %v1491_v9 = vld [vmem:[%s3745_s3 + $0x4d0] sm:$0xff]  ;;  %v1171_v14 = vld [vmem:[%s3749_s4 + $0x220] sm:$0xff] }
 0xd27   :  { %1313 = vmatprep.subr.mxu0 %v1199_v13  ;;  %v1475_v13 = vld [vmem:[%s3745_s3 + $0x450] sm:$0xff] }
 0xd28   :  { %1314 = vmatpush1.msra.mxu0 %v1198_v15  ;;  %v1490_v15 = vld [vmem:[%s3745_s3 + $0x4c8] sm:$0xff] }
 0xd29   :  { %1315 = vmatprep.subr.mxu0 %v1193_v17  ;;  %v1170_v17 = vld [vmem:[%s3749_s4 + $0x218] sm:$0xff] }
 0xd2a   :  { %1316 = vmatpush1.msra.mxu0 %v1192_v16  ;;  %v1474_v16 = vld [vmem:[%s3745_s3 + $0x448] sm:$0xff] }
 0xd2b   :  { %1317 = vmatprep.subr.mxu0 %v1187_v18  ;;  %v1165_v18 = vld [vmem:[%s3749_s4 + $0x1e8] sm:$0xff] }
 0xd2c   :  { %1318 = vmatpush1.msra.mxu0 %v1186_v19  ;;  %v1489_v19 = vld [vmem:[%s3745_s3 + $0x4c0] sm:$0xff] }
 0xd2d   :  { %1319 = vmatprep.subr.mxu0 %v1181_v20  ;;  %v1164_v20 = vld [vmem:[%s3749_s4 + $0x1e0] sm:$0xff] }
 0xd2e   :  { %1320 = vmatpush1.msra.mxu0 %v1180_v21  ;;  %v1473_v21 = vld [vmem:[%s3745_s3 + $0x440] sm:$0xff] }
 0xd2f   :  { %1321 = vmatprep.subr.mxu0 %v1175_v22  ;;  %v1159_v22 = vld [vmem:[%s3749_s4 + $0x1b0] sm:$0xff] }
 0xd30   :  { %1322 = vmatpush1.msra.mxu0 %v1174_v23  ;;  %v1488_v23 = vld [vmem:[%s3745_s3 + $0x4b8] sm:$0xff] }
 0xd31   :  { %1323 = vmatprep.subr.mxu0 %v1169_v24  ;;  %v1158_v24 = vld [vmem:[%s3749_s4 + $0x1a8] sm:$0xff] }
 0xd32   :  { %1324 = vmatpush1.msra.mxu0 %v1168_v25  ;;  %v1472_v25 = vld [vmem:[%s3745_s3 + $0x438] sm:$0xff] }
 0xd33   :  { %1325 = vmatprep.subr.mxu0 %v1163_v26  ;;  %v1153_v26 = vld [vmem:[%s3749_s4 + $0x178] sm:$0xff] }
 0xd34   :  { %1326 = vmatpush1.msra.mxu0 %v1162_v27  ;;  %v1487_v27 = vld [vmem:[%s3745_s3 + $0x4b0] sm:$0xff] }
 0xd35   :  { %1327 = vmatprep.subr.mxu0 %v1157_v28  ;;  %v1152_v28 = vld [vmem:[%s3749_s4 + $0x170] sm:$0xff] }
 0xd36   :  { %1328 = vmatpush1.msra.mxu0 %v1156_v29  ;;  %v1471_v29 = vld [vmem:[%s3745_s3 + $0x430] sm:$0xff] }
 0xd37   :  { %1329 = vmatprep.subr.mxu0 %v1151_v30  ;;  %v1147_v30 = vld [vmem:[%s3749_s4 + $0x140] sm:$0xff] }
 0xd38   :  { %1330 = vmatpush1.msra.mxu0 %v1150_v31  ;;  %v1486_v31 = vld [vmem:[%s3745_s3 + $0x4a8] sm:$0xff] }
 0xd39   :  { %1331 = vmatprep.subr.mxu0 %v1145_v32  ;;  %v1146_v32 = vld [vmem:[%s3749_s4 + $0x138] sm:$0xff] }
 0xd3a   :  { %1332 = vmatpush1.msra.mxu0 %v1144_v3  ;;  %v1470_v3 = vld [vmem:[%s3745_s3 + $0x428] sm:$0xff] }
 0xd3b   :  { %1333 = vmatprep.subr.mxu0 %v1139_v33  ;;  %v1141_v33 = vld [vmem:[%s3749_s4 + $0x108] sm:$0xff] }
 0xd3c   :  { %1334 = vmatpush1.msra.mxu0 %v1138_v34  ;;  %v1485_v34 = vld [vmem:[%s3745_s3 + $0x4a0] sm:$0xff] }
 0xd3d   :  { %1335 = vmatprep.subr.mxu0 %v1133_v8  ;;  %v1140_v8 = vld [vmem:[%s3749_s4 + $0x100] sm:$0xff] }
 0xd3e   :  { %1336 = vmatpush1.msra.mxu0 %v1132_v35  ;;  %v1469_v35 = vld [vmem:[%s3745_s3 + $0x420] sm:$0xff] }
 0xd3f   :  { %1337 = vmatprep.subr.mxu0 %v1127_v36  ;;  %v1135_v36 = vld [vmem:[%s3749_s4 + $0xd0] sm:$0xff] }
 0xd40   :  { %1338 = vmatpush1.msra.mxu0 %v1126_v11  ;;  %v1484_v11 = vld [vmem:[%s3745_s3 + $0x498] sm:$0xff] }
 0xd41   :  { %1339 = vmatprep.subr.mxu0 %v1121_v12  ;;  %v1468_v12 = vld [vmem:[%s3745_s3 + $0x418] sm:$0xff] }
 0xd42   :  { %1340 = vmatpush1.msra.mxu0 %v1120_v39  ;;  %v1483_v39 = vld [vmem:[%s3745_s3 + $0x490] sm:$0xff] }
 0xd43   :  { %1341 = vmatprep.subr.mxu0 %v1115_v41  ;;  %v1467_v41 = vld [vmem:[%s3745_s3 + $0x410] sm:$0xff] }
 0xd44   :  { %1342 = vmatpush1.msra.mxu0 %v1114_v43  ;;  %v1482_v43 = vld [vmem:[%s3745_s3 + $0x488] sm:$0xff] }
 0xd45   :  { %2103 = vmatprep.subr.mxu0 %v1496_v45  ;;  %v1466_v45 = vld [vmem:[%s3745_s3 + $0x408] sm:$0xff] }
 0xde5   :  { %v1107_v47 = vpop.f32.mrf.mxu0 }
 0xde6   :  { %v1108_v48 = vadd.f32 %v1913_v46, %v1107_v47  ;;  %v1117_v46 = vld [vmem:[%s3749_s4 + $0x28] sm:$0xff]  ;;  %v1481_v47 = vld [vmem:[%s3745_s3 + $0x480] sm:$0xff] }
 0xde7   :  { %v2336_v49 = vpop.f32.mrf.mxu0 }
 0xde8   :  { %v3245_v50 = vmax.f32 %v1108_v48, 0.0  ;;  %v1116_v48 = vld [vmem:[%s3749_s4 + $0x20] sm:$0xff] }
 0xde9   :  { %v1465_v49 = vld [vmem:[%s3745_s3 + $0x400] sm:$0xff] }
 0xdea   :  { %1305 = vmatmul.mubr.f32.vlgmr.msra.gmra.mxu1 %v3245_v50  ;;  %1376 = vmatmul.mubr.f32.vlgmr.msra.gmra.mxu0 %v3245_v50 }
 0xdeb   :  { %1383 = vmatpush1.msra.mxu1 %v1206_v51  ;;  %2104 = vmatpush3.msra.mxu0 %v1480_v52  ;;  %v1460_v51 = vld [vmem:[%s3751_s1 + $0x8] sm:$0xff]  ;;  %v1528_v52 = vld [vmem:[%s3745_s3 + $0x5f8] sm:$0xff] }
 0xdec   :  { %1384 = vmatprep.subr.mxu1 %v1201_v53  ;;  %2105 = vmatprep.subr.mxu0 %v1495_v54  ;;  %v1560_v53 = vld [vmem:[%s3745_s3 + $0x6f8] sm:$0xff]  ;;  %v1459_v54 = vld [vmem:[%s3751_s1] sm:$0xff] }
 0xded   :  { %1385 = vmatpush1.msra.mxu1 %v1200_v55  ;;  %2106 = vmatpush3.msra.mxu0 %v1479_v56  ;;  %v1512_v55 = vld [vmem:[%s3745_s3 + $0x578] sm:$0xff] }
 0xdee   :  { %1386 = vmatprep.subr.mxu1 %v1195_v57  ;;  %2107 = vmatprep.subr.mxu0 %v1494_v58  ;;  %v1544_v56 = vld [vmem:[%s3745_s3 + $0x678] sm:$0xff]  ;;  %v1527_v57 = vld [vmem:[%s3745_s3 + $0x5f0] sm:$0xff] }
 0xdef   :  { %1387 = vmatpush1.msra.mxu1 %v1194_v59  ;;  %2108 = vmatpush3.msra.mxu0 %v1478_v60  ;;  %v1559_v58 = vld [vmem:[%s3745_s3 + $0x6f0] sm:$0xff]  ;;  %v1526_v60 = vld [vmem:[%s3745_s3 + $0x5e8] sm:$0xff] }
 0xdf0   :  { %1388 = vmatprep.subr.mxu1 %v1189_v61  ;;  %2109 = vmatprep.subr.mxu0 %v1493_v62  ;;  %v1543_v59 = vld [vmem:[%s3745_s3 + $0x670] sm:$0xff]  ;;  %v1558_v61 = vld [vmem:[%s3745_s3 + $0x6e8] sm:$0xff] }
 0xdf1   :  { %1389 = vmatpush1.msra.mxu1 %v1188_v63  ;;  %2110 = vmatpush3.msra.mxu0 %v1477_v0  ;;  %v1510_v62 = vld [vmem:[%s3745_s3 + $0x568] sm:$0xff]  ;;  %v1525_v0 = vld [vmem:[%s3745_s3 + $0x5e0] sm:$0xff] }
 0xdf2   :  { %1390 = vmatprep.subr.mxu1 %v1183_v1  ;;  %2111 = vmatprep.subr.mxu0 %v1492_v2  ;;  %v1542_v63 = vld [vmem:[%s3745_s3 + $0x668] sm:$0xff]  ;;  %v1557_v1 = vld [vmem:[%s3745_s3 + $0x6e0] sm:$0xff] }
 0xdf3   :  { %1391 = vmatpush1.msra.mxu1 %v1182_v5  ;;  %2112 = vmatpush3.msra.mxu0 %v1476_v6  ;;  %v1509_v2 = vld [vmem:[%s3745_s3 + $0x560] sm:$0xff]  ;;  %v1524_v6 = vld [vmem:[%s3745_s3 + $0x5d8] sm:$0xff] }
 0xdf4   :  { %1392 = vmatprep.subr.mxu1 %v1177_v7  ;;  %2113 = vmatprep.subr.mxu0 %v1491_v9  ;;  %v1541_v5 = vld [vmem:[%s3745_s3 + $0x660] sm:$0xff]  ;;  %v1556_v7 = vld [vmem:[%s3745_s3 + $0x6d8] sm:$0xff] }
 0xdf5   :  { %1393 = vmatpush1.msra.mxu1 %v1176_v10  ;;  %2114 = vmatpush3.msra.mxu0 %v1475_v13  ;;  %v1508_v9 = vld [vmem:[%s3745_s3 + $0x558] sm:$0xff]  ;;  %v1523_v13 = vld [vmem:[%s3745_s3 + $0x5d0] sm:$0xff] }
 0xdf6   :  { %1394 = vmatprep.subr.mxu1 %v1171_v14  ;;  %2115 = vmatprep.subr.mxu0 %v1490_v15  ;;  %v1540_v10 = vld [vmem:[%s3745_s3 + $0x658] sm:$0xff]  ;;  %v1555_v14 = vld [vmem:[%s3745_s3 + $0x6d0] sm:$0xff] }
 0xdf7   :  { %1395 = vmatpush1.msra.mxu1 %v1170_v17  ;;  %2116 = vmatpush3.msra.mxu0 %v1474_v16  ;;  %v1507_v15 = vld [vmem:[%s3745_s3 + $0x550] sm:$0xff]  ;;  %v1522_v16 = vld [vmem:[%s3745_s3 + $0x5c8] sm:$0xff] }
 0xdf8   :  { %1396 = vmatprep.subr.mxu1 %v1165_v18  ;;  %2117 = vmatprep.subr.mxu0 %v1489_v19  ;;  %v1539_v17 = vld [vmem:[%s3745_s3 + $0x650] sm:$0xff]  ;;  %v1554_v18 = vld [vmem:[%s3745_s3 + $0x6c8] sm:$0xff] }
 0xdf9   :  { %1397 = vmatpush1.msra.mxu1 %v1164_v20  ;;  %2118 = vmatpush3.msra.mxu0 %v1473_v21  ;;  %v1506_v19 = vld [vmem:[%s3745_s3 + $0x548] sm:$0xff]  ;;  %v1521_v21 = vld [vmem:[%s3745_s3 + $0x5c0] sm:$0xff] }
 0xdfa   :  { %1398 = vmatprep.subr.mxu1 %v1159_v22  ;;  %2119 = vmatprep.subr.mxu0 %v1488_v23  ;;  %v1538_v20 = vld [vmem:[%s3745_s3 + $0x648] sm:$0xff]  ;;  %v1553_v22 = vld [vmem:[%s3745_s3 + $0x6c0] sm:$0xff] }
 0xdfb   :  { %1399 = vmatpush1.msra.mxu1 %v1158_v24  ;;  %2120 = vmatpush3.msra.mxu0 %v1472_v25  ;;  %v1505_v23 = vld [vmem:[%s3745_s3 + $0x540] sm:$0xff]  ;;  %v1520_v25 = vld [vmem:[%s3745_s3 + $0x5b8] sm:$0xff] }
 0xdfc   :  { %1400 = vmatprep.subr.mxu1 %v1153_v26  ;;  %2121 = vmatprep.subr.mxu0 %v1487_v27  ;;  %v1537_v24 = vld [vmem:[%s3745_s3 + $0x640] sm:$0xff]  ;;  %v1552_v26 = vld [vmem:[%s3745_s3 + $0x6b8] sm:$0xff] }
 0xdfd   :  { %1401 = vmatpush1.msra.mxu1 %v1152_v28  ;;  %2122 = vmatpush3.msra.mxu0 %v1471_v29  ;;  %v1504_v27 = vld [vmem:[%s3745_s3 + $0x538] sm:$0xff]  ;;  %v1519_v29 = vld [vmem:[%s3745_s3 + $0x5b0] sm:$0xff] }
 0xdfe   :  { %1402 = vmatprep.subr.mxu1 %v1147_v30  ;;  %2123 = vmatprep.subr.mxu0 %v1486_v31  ;;  %v1536_v28 = vld [vmem:[%s3745_s3 + $0x638] sm:$0xff]  ;;  %v1551_v30 = vld [vmem:[%s3745_s3 + $0x6b0] sm:$0xff] }
 0xdff   :  { %1403 = vmatpush1.msra.mxu1 %v1146_v32  ;;  %2124 = vmatpush3.msra.mxu0 %v1470_v3  ;;  %v1503_v31 = vld [vmem:[%s3745_s3 + $0x530] sm:$0xff]  ;;  %v1518_v3 = vld [vmem:[%s3745_s3 + $0x5a8] sm:$0xff] }
 0xe00   :  { %1404 = vmatprep.subr.mxu1 %v1141_v33  ;;  %2125 = vmatprep.subr.mxu0 %v1485_v34  ;;  %v1535_v32 = vld [vmem:[%s3745_s3 + $0x630] sm:$0xff]  ;;  %v1550_v33 = vld [vmem:[%s3745_s3 + $0x6a8] sm:$0xff] }
 0xe01   :  { %1405 = vmatpush1.msra.mxu1 %v1140_v8  ;;  %2126 = vmatpush3.msra.mxu0 %v1469_v35  ;;  %v1502_v34 = vld [vmem:[%s3745_s3 + $0x528] sm:$0xff]  ;;  %v1517_v35 = vld [vmem:[%s3745_s3 + $0x5a0] sm:$0xff] }
 0xe02   :  { %1406 = vmatprep.subr.mxu1 %v1135_v36  ;;  %2127 = vmatprep.subr.mxu0 %v1484_v11  ;;  %v1534_v8 = vld [vmem:[%s3745_s3 + $0x628] sm:$0xff]  ;;  %v1549_v36 = vld [vmem:[%s3745_s3 + $0x6a0] sm:$0xff] }
 0xe03   :  { %1407 = vmatpush1.msra.mxu1 %v1134_v37  ;;  %2128 = vmatpush3.msra.mxu0 %v1468_v12  ;;  %v1501_v11 = vld [vmem:[%s3745_s3 + $0x520] sm:$0xff]  ;;  %v1516_v12 = vld [vmem:[%s3745_s3 + $0x598] sm:$0xff] }
 0xe04   :  { %1408 = vmatprep.subr.mxu1 %v1129_v38  ;;  %2129 = vmatprep.subr.mxu0 %v1483_v39  ;;  %v1533_v37 = vld [vmem:[%s3745_s3 + $0x620] sm:$0xff]  ;;  %v1548_v38 = vld [vmem:[%s3745_s3 + $0x698] sm:$0xff] }
 0xe05   :  { %1409 = vmatpush1.msra.mxu1 %v1128_v40  ;;  %2130 = vmatpush3.msra.mxu0 %v1467_v41  ;;  %v1500_v39 = vld [vmem:[%s3745_s3 + $0x518] sm:$0xff]  ;;  %v1515_v41 = vld [vmem:[%s3745_s3 + $0x590] sm:$0xff] }
 0xe06   :  { %1410 = vmatprep.subr.mxu1 %v1123_v42  ;;  %2131 = vmatprep.subr.mxu0 %v1482_v43  ;;  %v1532_v40 = vld [vmem:[%s3745_s3 + $0x618] sm:$0xff]  ;;  %v1547_v42 = vld [vmem:[%s3745_s3 + $0x690] sm:$0xff] }
 0xe07   :  { %1411 = vmatpush1.msra.mxu1 %v1122_v44  ;;  %2132 = vmatpush3.msra.mxu0 %v1466_v45  ;;  %v1499_v43 = vld [vmem:[%s3745_s3 + $0x510] sm:$0xff]  ;;  %v1514_v45 = vld [vmem:[%s3745_s3 + $0x588] sm:$0xff] }
 0xe08   :  { %1412 = vmatprep.subr.mxu1 %v1117_v46  ;;  %2133 = vmatprep.subr.mxu0 %v1481_v47  ;;  %v1531_v44 = vld [vmem:[%s3745_s3 + $0x610] sm:$0xff]  ;;  %v1546_v46 = vld [vmem:[%s3745_s3 + $0x688] sm:$0xff] }
 0xe09   :  { %1413 = vmatpush1.msra.mxu1 %v1116_v48  ;;  %1446 = vmatprep.mubr.f32.mxu1 %v2422_v4  ;;  %v1498_v47 = vld [vmem:[%s3745_s3 + $0x508] sm:$0xff] }
 0xe0a   :  { %2134 = vmatpush3.msra.mxu0 %v1465_v49  ;;  %1447 = vmatmul.mubr.f32.vlgmr.msra.gmra.mxu1 %v3245_v50  ;;  %v1511_v50 = vld [vmem:[%s3745_s3 + $0x570] sm:$0xff]  ;;  %v1530_v48 = vld [vmem:[%s3745_s3 + $0x608] sm:$0xff]  ;;  %v1513_v49 = vld [vmem:[%s3745_s3 + $0x580] sm:$0xff] }
 0xe0b   :  { %1632 = vmatprep.mubr.f32.mxu0 %v1460_v51  ;;  %2138 = vmatprep.subr.mxu1 %v1528_v52  ;;  %v1545_v51 = vld [vmem:[%s3745_s3 + $0x680] sm:$0xff] }
 0xe0c   :  { %2173 = vmatprep.subr.mxu0 %v1560_v53  ;;  %1633 = vmatmul.mubr.f32.vlgmr.msra.gmra.mxu0 %v1459_v54  ;;  %v1497_v52 = vld [vmem:[%s3745_s3 + $0x500] sm:$0xff]  ;;  %v1462_v53 = vld [vmem:[%s3751_s1 + $0x18] sm:$0xff] }
 0xe0d   :  { %2139 = vmatpush3.msra.mxu1 %v1512_v55  ;;  %2174 = vmatpush3.msra.mxu0 %v1544_v56  ;;  %v1529_v54 = vld [vmem:[%s3745_s3 + $0x600] sm:$0xff]  ;;  %v1464_v55 = vld [vmem:[%s3751_s1 + $0x28] sm:$0xff]  ;;  %v1461_v56 = vld [vmem:[%s3751_s1 + $0x10] sm:$0xff] }
 0xe0e   :  { %2140 = vmatprep.subr.mxu1 %v1527_v57  ;;  %2175 = vmatprep.subr.mxu0 %v1559_v58  ;;  %v1463_v57 = vld [vmem:[%s3751_s1 + $0x20] sm:$0xff]  ;;  %v1794_v58 = vld [vmem:[%s3749_s4 + $0x378] sm:$0xff] }
 0xe0f   :  { %2141 = vmatpush3.msra.mxu1 %v1511_v50  ;;  %2176 = vmatpush3.msra.mxu0 %v1543_v59  ;;  %v1793_v50 = vld [vmem:[%s3749_s4 + $0x340] sm:$0xff]  ;;  %v1792_v59 = vld [vmem:[%s3749_s4 + $0x308] sm:$0xff] }
 0xe10   :  { %2142 = vmatprep.subr.mxu1 %v1526_v60  ;;  %2177 = vmatprep.subr.mxu0 %v1558_v61  ;;  %v1791_v60 = vld [vmem:[%s3749_s4 + $0x2d0] sm:$0xff]  ;;  %v1790_v61 = vld [vmem:[%s3749_s4 + $0x298] sm:$0xff] }
 0xe11   :  { %2143 = vmatpush3.msra.mxu1 %v1510_v62  ;;  %2178 = vmatpush3.msra.mxu0 %v1542_v63  ;;  %v1789_v62 = vld [vmem:[%s3749_s4 + $0x260] sm:$0xff]  ;;  %v1788_v63 = vld [vmem:[%s3749_s4 + $0x228] sm:$0xff] }
 0xe12   :  { %2144 = vmatprep.subr.mxu1 %v1525_v0  ;;  %2179 = vmatprep.subr.mxu0 %v1557_v1  ;;  %v1787_v0 = vld [vmem:[%s3749_s4 + $0x1f0] sm:$0xff]  ;;  %v1786_v1 = vld [vmem:[%s3749_s4 + $0x1b8] sm:$0xff] }
 0xe13   :  { %2145 = vmatpush3.msra.mxu1 %v1509_v2  ;;  %2180 = vmatpush3.msra.mxu0 %v1541_v5  ;;  %v1785_v2 = vld [vmem:[%s3749_s4 + $0x180] sm:$0xff]  ;;  %v1784_v5 = vld [vmem:[%s3749_s4 + $0x148] sm:$0xff] }
 0xe14   :  { %2146 = vmatprep.subr.mxu1 %v1524_v6  ;;  %2181 = vmatprep.subr.mxu0 %v1556_v7  ;;  %v1783_v6 = vld [vmem:[%s3749_s4 + $0x110] sm:$0xff]  ;;  %v1782_v7 = vld [vmem:[%s3749_s4 + $0xd8] sm:$0xff] }
 0xe15   :  { %2147 = vmatpush3.msra.mxu1 %v1508_v9  ;;  %2182 = vmatpush3.msra.mxu0 %v1540_v10  ;;  %v1781_v9 = vld [vmem:[%s3749_s4 + $0xa0] sm:$0xff]  ;;  %v1780_v10 = vld [vmem:[%s3749_s4 + $0x68] sm:$0xff] }
 0xe16   :  { %2148 = vmatprep.subr.mxu1 %v1523_v13  ;;  %2183 = vmatprep.subr.mxu0 %v1555_v14  ;;  %v1779_v13 = vld [vmem:[%s3749_s4 + $0x30] sm:$0xff]  ;;  %v1210_v14 = vlaneseq }
 0xe17   :  { %2149 = vmatpush3.msra.mxu1 %v1507_v15  ;;  %2184 = vmatpush3.msra.mxu0 %v1539_v17 }
 0xe18   :  { %2150 = vmatprep.subr.mxu1 %v1522_v16  ;;  %2185 = vmatprep.subr.mxu0 %v1554_v18  ;;  %v1211_v15 = vshrl.u32 %v1210_v14, 7  ;;  %v1208_v18 = vld [vmem:[%s3747_s5 + $0x4] sm:$0x3f] }
 0xe19   :  { %2151 = vmatpush3.msra.mxu1 %v1506_v19  ;;  %2186 = vmatpush3.msra.mxu0 %v1538_v20 }
 0xe1a   :  { %2152 = vmatprep.subr.mxu1 %v1521_v21  ;;  %2187 = vmatprep.subr.mxu0 %v1553_v22  ;;  %v1212_v17 = vsub.s32 0, %v1211_v15  ;;  %v1220_v16 = vsub.s32 2, %v1211_v15  ;;  %v1216_v19 = vsub.s32 1, %v1211_v15  ;;  %v1224_v20 = vsub.s32 3, %v1211_v15 }
 0xe1b   :  { %2153 = vmatpush3.msra.mxu1 %v1505_v23  ;;  %2188 = vmatpush3.msra.mxu0 %v1537_v24 }
 0xe1c   :  { %2154 = vmatprep.subr.mxu1 %v1520_v25  ;;  %2189 = vmatprep.subr.mxu0 %v1552_v26  ;;  %v1213_v21 = vrot.slane %v1208_v18, %v1212_v17  ;;  %v1221_v22 = vrot.slane %v1208_v18, %v1220_v16  ;;  %v1217_v23 = vrot.slane %v1208_v18, %v1216_v19 }
 0xe1d   :  { %2155 = vmatpush3.msra.mxu1 %v1504_v27  ;;  %2190 = vmatpush3.msra.mxu0 %v1536_v28  ;;  %v1225_v24 = vrot.slane %v1208_v18, %v1224_v20 }
 0xe1e   :  { %2156 = vmatprep.subr.mxu1 %v1519_v29  ;;  %2191 = vmatprep.subr.mxu0 %v1551_v30 }
 0xe1f   :  { %2157 = vmatpush3.msra.mxu1 %v1503_v31  ;;  %2192 = vmatpush3.msra.mxu0 %v1535_v32 }
 0xe20   :  { %2158 = vmatprep.subr.mxu1 %v1518_v3  ;;  %2193 = vmatprep.subr.mxu0 %v1550_v33 }
 0xe21   :  { %2159 = vmatpush3.msra.mxu1 %v1502_v34  ;;  %2194 = vmatpush3.msra.mxu0 %v1534_v8  ;;  %v1228_v8 = vsub.s32 4, %v1211_v15 }
 0xe22   :  { %2160 = vmatprep.subr.mxu1 %v1517_v35  ;;  %2195 = vmatprep.subr.mxu0 %v1549_v36  ;;  %v1232_v35 = vsub.s32 5, %v1211_v15 }
 0xe23   :  { %2161 = vmatpush3.msra.mxu1 %v1501_v11  ;;  %2196 = vmatpush3.msra.mxu0 %v1533_v37  ;;  %v1229_v36 = vrot.slane %v1208_v18, %v1228_v8 }
 0xe24   :  { %2162 = vmatprep.subr.mxu1 %v1516_v12  ;;  %2197 = vmatprep.subr.mxu0 %v1548_v38  ;;  %v1233_v11 = vrot.slane %v1208_v18, %v1232_v35 }
 0xe25   :  { %2163 = vmatpush3.msra.mxu1 %v1500_v39  ;;  %2198 = vmatpush3.msra.mxu0 %v1532_v40 }
 0xe26   :  { %2164 = vmatprep.subr.mxu1 %v1515_v41  ;;  %2199 = vmatprep.subr.mxu0 %v1547_v42 }
 0xe27   :  { %2165 = vmatpush3.msra.mxu1 %v1499_v43  ;;  %2200 = vmatpush3.msra.mxu0 %v1531_v44 }
 0xe28   :  { %2166 = vmatprep.subr.mxu1 %v1514_v45  ;;  %2201 = vmatprep.subr.mxu0 %v1546_v46  ;;  %v1915_v45 = vld [vmem:[%s3747_s5 + $0xa] ss:$0 sm:$0xff] }
 0xe29   :  { %2167 = vmatpush3.msra.mxu1 %v1498_v47  ;;  %2202 = vmatpush3.msra.mxu0 %v1530_v48 }
 0xe2a   :  { %2168 = vmatprep.subr.mxu1 %v1513_v49  ;;  %2203 = vmatprep.subr.mxu0 %v1545_v51 }
 0xe2b   :  { %2169 = vmatpush3.msra.mxu1 %v1497_v52  ;;  %1702 = vmatprep.mubr.f32.mxu1 %v1462_v53 }
 0xe2c   :  { %2204 = vmatpush3.msra.mxu0 %v1529_v54  ;;  %1772 = vmatprep.mubr.f32.mxu0 %v1464_v55 }
 0xe2d   :  { %1703 = vmatmul.mubr.f32.vlgmr.msra.gmra.mxu1 %v1461_v56  ;;  %1773 = vmatmul.mubr.f32.vlgmr.msra.gmra.mxu0 %v1463_v57  ;;  %v1916_v57 = vld [vmem:[%s3747_s5 + $0xb] ss:$0 sm:$0xff] }
 0xe2e   :  { %2337 = vmatprep.subr.mxu1 %v2422_v4  ;;  %2369 = vmatprep.mubr.msk.f32.mxu1 %vm2423_vm0, %v2422_v4 }
 0xe2f   :  { %2338 = vmatpush3.msra.mxu1 %v1794_v58 }
 0xe30   :  { %2339 = vmatprep.subr.mxu1 %v2422_v4 }
 0xe31   :  { %2340 = vmatpush3.msra.mxu1 %v1793_v50 }
 0xe32   :  { %2341 = vmatprep.subr.mxu1 %v2422_v4 }
 0xe33   :  { %2342 = vmatpush3.msra.mxu1 %v1792_v59 }
 0xe34   :  { %2343 = vmatprep.subr.mxu1 %v2422_v4 }
 0xe35   :  { %2344 = vmatpush3.msra.mxu1 %v1791_v60  ;;  %v1884_v60 = vpop.permute.xlu1 %1883 }
 0xe36   :  { %2345 = vmatprep.subr.mxu1 %v2422_v4 }
 0xe37   :  { %2346 = vmatpush3.msra.mxu1 %v1790_v61 }
 0xe38   :  { %2347 = vmatprep.subr.mxu1 %v2422_v4 }
 0xe39   :  { %2348 = vmatpush3.msra.mxu1 %v1789_v62 }
 0xe3a   :  { %2349 = vmatprep.subr.mxu1 %v2422_v4 }
 0xe3b   :  { %2350 = vmatpush3.msra.mxu1 %v1788_v63 }
 0xe3c   :  { %2351 = vmatprep.subr.mxu1 %v2422_v4 }
 0xe3d   :  { %2352 = vmatpush3.msra.mxu1 %v1787_v0 }
 0xe3e   :  { %2353 = vmatprep.subr.mxu1 %v2422_v4 }
 0xe3f   :  { %2354 = vmatpush3.msra.mxu1 %v1786_v1 }
 0xe40   :  { %2355 = vmatprep.subr.mxu1 %v2422_v4 }
 0xe41   :  { %2356 = vmatpush3.msra.mxu1 %v1785_v2 }
 0xe42   :  { %2357 = vmatprep.subr.mxu1 %v2422_v4 }
 0xe43   :  { %2358 = vmatpush3.msra.mxu1 %v1784_v5 }
 0xe44   :  { %2359 = vmatprep.subr.mxu1 %v2422_v4 }
 0xe45   :  { %2360 = vmatpush3.msra.mxu1 %v1783_v6 }
 0xe46   :  { %2361 = vmatprep.subr.mxu1 %v2422_v4 }
 0xe47   :  { %2362 = vmatpush3.msra.mxu1 %v1782_v7 }
 0xe48   :  { %2363 = vmatprep.subr.mxu1 %v2422_v4 }
 0xe49   :  { %2364 = vmatpush3.msra.mxu1 %v1781_v9 }
 0xe4a   :  { %2365 = vmatprep.subr.mxu1 %v2422_v4 }
 0xe4b   :  { %2366 = vmatpush3.msra.mxu1 %v1780_v10 }
 0xe4c   :  { %2367 = vmatprep.subr.mxu1 %v2422_v4 }
 0xe4d   :  { %2368 = vmatpush3.msra.mxu1 %v1779_v13 }
 0xeaa   :  { %v1306_v4 = vpop.f32.mrf.mxu1  ;;  %v1377_v25 = vpop.f32.mrf.mxu0 }
 0xeab   :  { %v1307_v26 = vadd.f32 %v1306_v4, %v1213_v21  ;;  %v1378_v27 = vadd.f32 %v1377_v25, %v1221_v22 }
 0xeac   :  { %v1308_v28 = vpop.f32.mrf.mxu1  ;;  %v1379_v29 = vpop.f32.mrf.mxu0 }
 0xead   :  { %2410 = vtanh.f32 %v1307_v26  ;;  %v1309_v30 = vadd.f32 %v1308_v28, %v1217_v23  ;;  %v1380_v31 = vadd.f32 %v1379_v29, %v1225_v24 }
 0xeae   :  { %2412 = vtanh.f32 %v1378_v27 }
 0xeaf   :  { %2414 = vtanh.f32 %v1309_v30 }
 0xeb0   :  { %2416 = vtanh.f32 %v1380_v31 }
 0xeba   :  { %v2411_v32 = vpop.eup %2410 }
 0xebb   :  { %v2413_v3 = vpop.eup %2412  ;;  %1872 = vst [vmem:[%s3752_s6] sm:$0xff] %v2411_v32 }
 0xebc   :  { %v2415_v33 = vpop.eup %2414  ;;  %1874 = vst [vmem:[%s3752_s6 + $0x10] sm:$0xff] %v2413_v3 }
 0xebd   :  { %v2417_v34 = vpop.eup %2416  ;;  %1873 = vst [vmem:[%s3752_s6 + $0x8] sm:$0xff] %v2415_v33 }
 0xebe   :  { %1875 = vst [vmem:[%s3752_s6 + $0x18] sm:$0xff] %v2417_v34 }
 0xeca   :  { %v1448_v37 = vpop.f32.mrf.mxu1 }
 0xecb   :  { %v1449_v12 = vadd.f32 %v1448_v37, %v1229_v36 }
 0xecc   :  { %v1450_v38 = vpop.f32.mrf.mxu1  ;;  %v2135_v42 = vpop.f32.mrf.mxu0 }
 0xecd   :  { %2418 = vtanh.f32 %v1449_v12  ;;  %v1451_v39 = vadd.f32 %v1450_v38, %v1233_v11 }
 0xece   :  { %v2136_v43 = vpop.f32.mrf.mxu0 }
 0xecf   :  { %2420 = vtanh.f32 %v1451_v39  ;;  %v2137_v44 = vadd.f32 %v2136_v43, %v2135_v42 }
 0xed1   :  { %v1635_v51 = vadd.f32 %v2137_v44, %v1915_v45 }
 0xeda   :  { %v2419_v40 = vpop.eup %2418 }
 0xedb   :  { %1876 = vst [vmem:[%s3752_s6 + $0x20] sm:$0xff] %v2419_v40 }
 0xedc   :  { %v2421_v41 = vpop.eup %2420 }
 0xedd   :  { %1877 = vst [vmem:[%s3752_s6 + $0x28] sm:$0xff] %v2421_v41 }
 0xeed   :  { %v2170_v46 = vpop.f32.mrf.mxu1  ;;  %v2205_v47 = vpop.f32.mrf.mxu0 }
 0xeef   :  { %v2171_v48 = vpop.f32.mrf.mxu1  ;;  %v2206_v49 = vpop.f32.mrf.mxu0 }
 0xef0   :  { %v2172_v52 = vadd.f32 %v2171_v48, %v2170_v46  ;;  %v2207_v54 = vadd.f32 %v2206_v49, %v2205_v47 }
 0xef2   :  { %v1705_v53 = vadd.f32 %v2172_v52, %v1635_v51 }
 0xef4   :  { %v1775_v55 = vadd.f32 %v2207_v54, %v1705_v53 }
 0xef6   :  { %v1778_v56 = vmax.f32 %v1775_v55, 0.0 }
 0xef8   :  { %2370 = vmatmul.mubr.f32.vlgmr.msra.gmra.mxu1 %v1778_v56 }
 0xfb8   :  { %v1868_v58 = vpop.f32.mrf.mxu1 }
 0xfb9   :  { %v1869_v50 = vadd.f32 %v1916_v57, %v1868_v58 }
 0xfba   :  { %v2371_v59 = vpop.f32.mrf.mxu1 }
 0xfbb   :  { %1887 = vrot.lane.b32.xlu0 %v1869_v50, %s2424_s30 }
0x102d   :  { %v1888_v61 = vpop.permute.xlu0 %1887 }
0x102e   :  { %v1891_v62 = vsel %vm1037_vm2, %v1884_v60, %v1888_v61 }
0x102f   :  { %1893 = vst [vmem:[%s3750_s7 + $0x8] sm:$0xff] %v1891_v62 }

</bundles_post_ra>
